<compile_context>
chip_gen: v7x
topology: tpu7x:2x2x1
jax: 0.10.0
libtpu: 0.0.40
codegen_flags: <defaults>
</compile_context>

<pallas_src>
import functools

import jax
import jax.numpy as jnp
from jax.experimental import pallas as pl
from jax.experimental.pallas import tpu as pltpu


# ----------------------------------------------------------------------------
# Tiling helpers
# ----------------------------------------------------------------------------
def _round_up(x, m):
    return ((x + m - 1) // m) * m


def _pick_tile(size, base, target):
    """Largest multiple of `base` <= min(target, size) that divides `size`.

    `size` must already be a multiple of `base`."""
    best = base
    t = base
    limit = min(target, size)
    while t <= limit:
        if size % t == 0:
            best = t
        t += base
    return best


def _choose_m_tiling(m):
    mp = _round_up(m, 8)
    tm = _pick_tile(mp, 8, 256)
    if tm < 64 and mp > 512:
        # Awkward (large, divisor-poor) M: pad a little more for a healthy tile.
        tm = 256
        mp = _round_up(m, tm)
    return mp, tm


# ----------------------------------------------------------------------------
# Pallas kernel: tiled matmul with f32 accumulator, fused bias + LeakyReLU(0.2)
# ----------------------------------------------------------------------------
def _matmul_bias_act_kernel(a_ref, w_ref, b_ref, o_ref, acc_ref, *,
                            apply_act, negative_slope):
    k = pl.program_id(2)

    @pl.when(k == 0)
    def _init():
        acc_ref[...] = jnp.zeros_like(acc_ref)

    acc_ref[...] += jnp.dot(a_ref[...], w_ref[...],
                            preferred_element_type=jnp.float32)

    @pl.when(k == pl.num_programs(2) - 1)
    def _epilogue():
        out = acc_ref[...] + b_ref[...]          # (1, tn) broadcast, once per tile
        if apply_act:
            out = jnp.where(out > 0, out, negative_slope * out)
        o_ref[...] = out.astype(o_ref.dtype)


def matmul_bias_act(a_bf16, w_pad, b_pad, *, n_valid, apply_act,
                    out_dtype=jnp.float32, negative_slope=0.2):
    """a_bf16: [M, K] bf16 (unpadded); w_pad: [Kp, Np] bf16 (prepared once per
    layer, Kp/Np multiples of 128); b_pad: [1, Np] f32.
    Returns [M, n_valid] in `out_dtype`."""
    M, K = a_bf16.shape
    Kp, Np = w_pad.shape

    Mp, tm = _choose_m_tiling(M)
    tk = _pick_tile(Kp, 128, 512)
    tn = _pick_tile(Np, 128, 256)

    # Only pad the activation remainders (weights/bias were padded at prep time).
    if (Mp, Kp) != (M, K):
        a_bf16 = jnp.pad(a_bf16, ((0, Mp - M), (0, Kp - K)))

    grid = (Mp // tm, Np // tn, Kp // tk)

    kernel = functools.partial(_matmul_bias_act_kernel,
                               apply_act=apply_act,
                               negative_slope=negative_slope)

    out_bytes = jnp.dtype(out_dtype).itemsize
    cost = pl.CostEstimate(
        flops=2 * Mp * Np * Kp,
        transcendentals=0,
        bytes_accessed=Mp * Kp * 2 + Kp * Np * 2 + Mp * Np * out_bytes + Np * 4,
    )

    out = pl.pallas_call(
        kernel,
        out_shape=jax.ShapeDtypeStruct((Mp, Np), out_dtype),
        grid=grid,
        in_specs=[
            pl.BlockSpec((tm, tk), lambda i, j, k: (i, k)),
            pl.BlockSpec((tk, tn), lambda i, j, k: (k, j)),
            pl.BlockSpec((1, tn), lambda i, j, k: (0, j)),
        ],
        out_specs=pl.BlockSpec((tm, tn), lambda i, j, k: (i, j)),
        scratch_shapes=[pltpu.VMEM((tm, tn), jnp.float32)],
        compiler_params=pltpu.CompilerParams(
            dimension_semantics=("parallel", "parallel", "arbitrary"),
            vmem_limit_bytes=32 * 1024 * 1024,
        ),
        cost_estimate=cost,
    )(a_bf16, w_pad, b_pad)

    if (Mp, Np) != (M, n_valid):
        out = out[:M, :n_valid]
    return out


# ----------------------------------------------------------------------------
# Conv2d (k=3, p=1) = im2col (glue, bf16) + tiled Pallas matmul
# ----------------------------------------------------------------------------
def conv2d_3x3_pallas(x_nhwc, w2d_pad, b_pad, *, cout, stride, apply_act,
                      out_dtype):
    """x_nhwc: [N,H,W,Cin]; w2d_pad: [round128(9*Cin), round128(Cout)] bf16."""
    N, H, W, Cin = x_nhwc.shape
    Ho = (H + 2 - 3) // stride + 1
    Wo = (W + 2 - 3) // stride + 1

    # Spatial zero-pad once; activations travel in bf16 (halves HBM traffic
    # into the MXU; accumulation stays f32 inside the kernel).
    x_pad = jnp.pad(x_nhwc.astype(jnp.bfloat16), ((0, 0), (1, 1), (1, 1), (0, 0)))

    # im2col patch matrix, feature order (dy, dx, cin) matching w2d_pad.
    # TODO(synk): fuse the 9-tap shifted/strided gather into the kernel's
    # reduction axis via manual pl.ANY + make_async_copy to avoid materializing
    # the patch matrix in HBM (not expressible with plain BlockSpec index maps).
    patches = []
    for dy in range(3):
        for dx in range(3):
            patches.append(
                x_pad[:, dy:dy + (Ho - 1) * stride + 1:stride,
                         dx:dx + (Wo - 1) * stride + 1:stride, :])
    a = jnp.concatenate(patches, axis=-1).reshape(N * Ho * Wo, 9 * Cin)

    out = matmul_bias_act(a, w2d_pad, b_pad, n_valid=cout, apply_act=apply_act,
                          out_dtype=out_dtype)
    return out.reshape(N, Ho, Wo, cout)


# ----------------------------------------------------------------------------
# Spectral normalization (matches torch's forward: one power iteration,
# W_bar = W / sigma).  Parameter setup, plain JAX, hoisted out of the forward.
# ----------------------------------------------------------------------------
def spectral_normalize(w_oihw, u, eps=1e-12):
    cout = w_oihw.shape[0]
    w_mat = w_oihw.reshape(cout, -1)
    v = w_mat.T @ u
    v = v / (jnp.linalg.norm(v) + eps)
    u_new = w_mat @ v
    u_new = u_new / (jnp.linalg.norm(u_new) + eps)
    sigma = u_new @ (w_mat @ v)
    return w_oihw / sigma


# ----------------------------------------------------------------------------
# Parameters
# ----------------------------------------------------------------------------
_BASE = 64


def layer_config(ch_input):
    # (cin, cout, stride, leaky_relu)
    return (
        (ch_input, _BASE * 1, 2, True),
        (_BASE * 1, _BASE * 2, 2, True),
        (_BASE * 2, _BASE * 4, 2, True),
        (_BASE * 4, _BASE * 8, 1, True),
        (_BASE * 8, 1, 1, False),
    )


def init_params(key, ch_input):
    params = []
    for cin, cout, _, _ in layer_config(ch_input):
        key, kw, kb, ku = jax.random.split(key, 4)
        w = 0.05 * jax.random.normal(kw, (cout, cin, 3, 3), jnp.float32)
        b = 0.01 * jax.random.normal(kb, (cout,), jnp.float32)
        u = jax.random.normal(ku, (cout,), jnp.float32)
        u = u / (jnp.linalg.norm(u) + 1e-12)
        params.append(dict(w=w, b=b, u=u))
    return params


def prepare_params(params):
    """One-time prep: spectral norm, 2D reshape, 128-padding, bf16 cast.

    Kept out of the per-forward path (weights are static at inference)."""
    prepared = []
    for p in params:
        w_sn = spectral_normalize(p["w"], p["u"])
        cout, cin = w_sn.shape[0], w_sn.shape[1]
        k = 9 * cin
        kp = _round_up(k, 128)
        np_ = _round_up(cout, 128)
        # weight -> [dy, dx, cin, cout] -> [9*Cin, Cout], matching patch order.
        w2d = jnp.transpose(w_sn, (2, 3, 1, 0)).reshape(k, cout)
        w2d = jnp.pad(w2d, ((0, kp - k), (0, np_ - cout))).astype(jnp.bfloat16)
        b2d = jnp.pad(p["b"], (0, np_ - cout)).reshape(1, np_).astype(jnp.float32)
        prepared.append((w2d, b2d))
    return tuple(prepared)


# ----------------------------------------------------------------------------
# Forward pass (NCHW in / NCHW out, NHWC internally)
# ----------------------------------------------------------------------------
@functools.partial(jax.jit, static_argnames=("cfg",))
def discriminator_forward(x_nchw, weights, cfg):
    x = jnp.transpose(x_nchw, (0, 2, 3, 1))
    n_layers = len(cfg)
    for li, ((w2d, b2d), (_, cout, stride, act)) in enumerate(zip(weights, cfg)):
        last = li == n_layers - 1
        x = conv2d_3x3_pallas(
            x, w2d, b2d, cout=cout, stride=stride, apply_act=act,
            # Intermediate activations stay bf16 (half the HBM writeback +
            # next-layer reads); the final logits come out in f32.
            out_dtype=jnp.float32 if last else jnp.bfloat16)
    return jnp.transpose(x, (0, 3, 1, 2))


if __name__ == "__main__":
    key = jax.random.PRNGKey(0)
    key, kx = jax.random.split(key)

    batch, ch_input, spatial = 2, 4, 16
    x = jax.random.normal(kx, (batch, ch_input, spatial, spatial), jnp.float32)

    cfg = layer_config(ch_input)
    params = init_params(key, ch_input)
    weights = prepare_params(params)          # spectral norm + padding, once

    out = discriminator_forward(x, weights, cfg)
    out = jax.block_until_ready(out)

    # Expected shape: 16 -> 8 -> 4 -> 2 -> 2 -> 2, Cout=1  => (2, 1, 2, 2)
    assert out.shape == (batch, 1, spatial // 8, spatial // 8), out.shape
    assert out.dtype == jnp.float32
    assert bool(jnp.all(jnp.isfinite(out)))
    print("KERNEL_OK")
</pallas_src>

<mosaic_0001>
module attributes {stable_mosaic.version = 11 : i64} {
  func.func @_matmul_bias_act_kernel(%arg0: i32, %arg1: i32, %arg2: i32, %arg3: memref<128x128xbf16, #tpu.memory_space<vmem>>, %arg4: memref<128x128xbf16, #tpu.memory_space<vmem>>, %arg5: memref<1x128xf32, #tpu.memory_space<vmem>>, %arg6: memref<128x128xbf16, #tpu.memory_space<vmem>>, %arg7: memref<128x128xf32, #tpu.memory_space<vmem>>) attributes {dimension_semantics = [#tpu.dimension_semantics<parallel>, #tpu.dimension_semantics<parallel>, #tpu.dimension_semantics<arbitrary>], iteration_bounds = array<i64: 1, 1, 1>, scalar_prefetch = 0 : i64, scratch_operands = 1 : i64, tpu.core_type = #tpu.core_type<tc>, window_params = [{transform_indices = @transform_0, window_bounds = array<i64: 128, 128>}, {transform_indices = @transform_1, window_bounds = array<i64: 128, 128>}, {transform_indices = @transform_2, window_bounds = array<i64: 1, 128>}, {transform_indices = @transform_3, window_bounds = array<i64: 128, 128>}]} {
    %c0_i32 = arith.constant 0 : i32
    %0 = arith.cmpi eq, %arg2, %c0_i32 : i32
    %1 = arith.extui %0 : i1 to i32
    %c0_i32_0 = arith.constant 0 : i32
    %2 = arith.cmpi ne, %1, %c0_i32_0 : i32
    scf.if %2 {
      %cst_10 = arith.constant 0.000000e+00 : f32
      %12 = vector.broadcast %cst_10 : f32 to vector<128x128xf32>
      %c0_11 = arith.constant 0 : index
      %c0_12 = arith.constant 0 : index
      %13 = vector.load %arg7[%c0_11, %c0_12] : memref<128x128xf32, #tpu.memory_space<vmem>>, vector<128x128xf32>
      tpu.vector_store %arg7[%c0_11, %c0_12], %12 {strides = array<i32>} : memref<128x128xf32, #tpu.memory_space<vmem>>, vector<128x128xf32>,
    } else {
    }
    %c0 = arith.constant 0 : index
    %c0_1 = arith.constant 0 : index
    %3 = vector.load %arg7[%c0, %c0_1] : memref<128x128xf32, #tpu.memory_space<vmem>>, vector<128x128xf32>
    %c0_2 = arith.constant 0 : index
    %c0_3 = arith.constant 0 : index
    %4 = vector.load %arg3[%c0_2, %c0_3] : memref<128x128xbf16, #tpu.memory_space<vmem>>, vector<128x128xbf16>
    %c0_4 = arith.constant 0 : index
    %c0_5 = arith.constant 0 : index
    %5 = vector.load %arg4[%c0_4, %c0_5] : memref<128x128xbf16, #tpu.memory_space<vmem>>, vector<128x128xbf16>
    %cst = arith.constant dense<0.000000e+00> : vector<128x128xf32>
    %6 = tpu.matmul %4, %5, %cst {dimension_numbers = #tpu.dot_dimension_numbers<[1], [0], [0], [1], [0, 0, 1, 1], [], []>} : vector<128x128xbf16>, vector<128x128xbf16>, vector<128x128xf32> -> vector<128x128xf32>
    %7 = arith.addf %3, %6 : vector<128x128xf32>
    %c0_6 = arith.constant 0 : index
    %c0_7 = arith.constant 0 : index
    %8 = vector.load %arg7[%c0_6, %c0_7] : memref<128x128xf32, #tpu.memory_space<vmem>>, vector<128x128xf32>
    tpu.vector_store %arg7[%c0_6, %c0_7], %7 {strides = array<i32>} : memref<128x128xf32, #tpu.memory_space<vmem>>, vector<128x128xf32>,
    %c0_i32_8 = arith.constant 0 : i32
    %9 = arith.cmpi eq, %arg2, %c0_i32_8 : i32
    %10 = arith.extui %9 : i1 to i32
    %c0_i32_9 = arith.constant 0 : i32
    %11 = arith.cmpi ne, %10, %c0_i32_9 : i32
    scf.if %11 {
      %c0_10 = arith.constant 0 : index
      %c0_11 = arith.constant 0 : index
      %12 = vector.load %arg7[%c0_10, %c0_11] : memref<128x128xf32, #tpu.memory_space<vmem>>, vector<128x128xf32>
      %c0_12 = arith.constant 0 : index
      %c0_13 = arith.constant 0 : index
      %13 = vector.load %arg5[%c0_12, %c0_13] : memref<1x128xf32, #tpu.memory_space<vmem>>, vector<1x128xf32>
      %14 = vector.broadcast %13 : vector<1x128xf32> to vector<128x128xf32>
      %15 = arith.addf %12, %14 : vector<128x128xf32>
      %cst_14 = arith.constant 0.000000e+00 : f32
      %16 = vector.broadcast %cst_14 : f32 to vector<128x128xf32>
      %17 = arith.cmpf ogt, %15, %16 : vector<128x128xf32>
      %cst_15 = arith.constant 2.000000e-01 : f32
      %18 = vector.broadcast %cst_15 : f32 to vector<128x128xf32>
      %19 = arith.mulf %18, %15 : vector<128x128xf32>
      %20 = arith.select %17, %15, %19 : vector<128x128xi1>, vector<128x128xf32>
      %21 = arith.truncf %20 : vector<128x128xf32> to vector<128x128xbf16>
      %c0_16 = arith.constant 0 : index
      %c0_17 = arith.constant 0 : index
      %22 = vector.load %arg6[%c0_16, %c0_17] : memref<128x128xbf16, #tpu.memory_space<vmem>>, vector<128x128xbf16>
      tpu.vector_store %arg6[%c0_16, %c0_17], %21 {strides = array<i32>} : memref<128x128xbf16, #tpu.memory_space<vmem>>, vector<128x128xbf16>,
    } else {
    }
    return
  }
  func.func @transform_0(%arg0: i32, %arg1: i32, %arg2: i32) -> (i32, i32) {
    %c0_i32 = arith.constant 0 : i32
    return %arg0, %arg2 : i32, i32
  }
  func.func @transform_1(%arg0: i32, %arg1: i32, %arg2: i32) -> (i32, i32) {
    %c0_i32 = arith.constant 0 : i32
    return %arg2, %arg1 : i32, i32
  }
  func.func @transform_2(%arg0: i32, %arg1: i32, %arg2: i32) -> (i32, i32) {
    %c0_i32 = arith.constant 0 : i32
    %c0_i32_0 = arith.constant 0 : i32
    return %c0_i32, %arg1 : i32, i32
  }
  func.func @transform_3(%arg0: i32, %arg1: i32, %arg2: i32) -> (i32, i32) {
    %c0_i32 = arith.constant 0 : i32
    return %arg0, %arg1 : i32, i32
  }
}

module attributes {stable_mosaic.version = 11 : i64} {
  func.func @_matmul_bias_act_kernel(%arg0: i32, %arg1: i32, %arg2: i32, %arg3: memref<32x128xbf16, #tpu.memory_space<vmem>>, %arg4: memref<128x128xbf16, #tpu.memory_space<vmem>>, %arg5: memref<1x128xf32, #tpu.memory_space<vmem>>, %arg6: memref<32x128xbf16, #tpu.memory_space<vmem>>, %arg7: memref<32x128xf32, #tpu.memory_space<vmem>>) attributes {dimension_semantics = [#tpu.dimension_semantics<parallel>, #tpu.dimension_semantics<parallel>, #tpu.dimension_semantics<arbitrary>], iteration_bounds = array<i64: 1, 1, 5>, scalar_prefetch = 0 : i64, scratch_operands = 1 : i64, tpu.core_type = #tpu.core_type<tc>, window_params = [{transform_indices = @transform_0, window_bounds = array<i64: 32, 128>}, {transform_indices = @transform_1, window_bounds = array<i64: 128, 128>}, {transform_indices = @transform_2, window_bounds = array<i64: 1, 128>}, {transform_indices = @transform_3, window_bounds = array<i64: 32, 128>}]} {
    %c0_i32 = arith.constant 0 : i32
    %0 = arith.cmpi eq, %arg2, %c0_i32 : i32
    %1 = arith.extui %0 : i1 to i32
    %c0_i32_0 = arith.constant 0 : i32
    %2 = arith.cmpi ne, %1, %c0_i32_0 : i32
    scf.if %2 {
      %cst_9 = arith.constant 0.000000e+00 : f32
      %12 = vector.broadcast %cst_9 : f32 to vector<32x128xf32>
      %c0_10 = arith.constant 0 : index
      %c0_11 = arith.constant 0 : index
      %13 = vector.load %arg7[%c0_10, %c0_11] : memref<32x128xf32, #tpu.memory_space<vmem>>, vector<32x128xf32>
      tpu.vector_store %arg7[%c0_10, %c0_11], %12 {strides = array<i32>} : memref<32x128xf32, #tpu.memory_space<vmem>>, vector<32x128xf32>,
    } else {
    }
    %c0 = arith.constant 0 : index
    %c0_1 = arith.constant 0 : index
    %3 = vector.load %arg7[%c0, %c0_1] : memref<32x128xf32, #tpu.memory_space<vmem>>, vector<32x128xf32>
    %c0_2 = arith.constant 0 : index
    %c0_3 = arith.constant 0 : index
    %4 = vector.load %arg3[%c0_2, %c0_3] : memref<32x128xbf16, #tpu.memory_space<vmem>>, vector<32x128xbf16>
    %c0_4 = arith.constant 0 : index
    %c0_5 = arith.constant 0 : index
    %5 = vector.load %arg4[%c0_4, %c0_5] : memref<128x128xbf16, #tpu.memory_space<vmem>>, vector<128x128xbf16>
    %cst = arith.constant dense<0.000000e+00> : vector<32x128xf32>
    %6 = tpu.matmul %4, %5, %cst {dimension_numbers = #tpu.dot_dimension_numbers<[1], [0], [0], [1], [0, 0, 1, 1], [], []>} : vector<32x128xbf16>, vector<128x128xbf16>, vector<32x128xf32> -> vector<32x128xf32>
    %7 = arith.addf %3, %6 : vector<32x128xf32>
    %c0_6 = arith.constant 0 : index
    %c0_7 = arith.constant 0 : index
    %8 = vector.load %arg7[%c0_6, %c0_7] : memref<32x128xf32, #tpu.memory_space<vmem>>, vector<32x128xf32>
    tpu.vector_store %arg7[%c0_6, %c0_7], %7 {strides = array<i32>} : memref<32x128xf32, #tpu.memory_space<vmem>>, vector<32x128xf32>,
    %c4_i32 = arith.constant 4 : i32
    %9 = arith.cmpi eq, %arg2, %c4_i32 : i32
    %10 = arith.extui %9 : i1 to i32
    %c0_i32_8 = arith.constant 0 : i32
    %11 = arith.cmpi ne, %10, %c0_i32_8 : i32
    scf.if %11 {
      %c0_9 = arith.constant 0 : index
      %c0_10 = arith.constant 0 : index
      %12 = vector.load %arg7[%c0_9, %c0_10] : memref<32x128xf32, #tpu.memory_space<vmem>>, vector<32x128xf32>
      %c0_11 = arith.constant 0 : index
      %c0_12 = arith.constant 0 : index
      %13 = vector.load %arg5[%c0_11, %c0_12] : memref<1x128xf32, #tpu.memory_space<vmem>>, vector<1x128xf32>
      %14 = vector.broadcast %13 : vector<1x128xf32> to vector<32x128xf32>
      %15 = arith.addf %12, %14 : vector<32x128xf32>
      %cst_13 = arith.constant 0.000000e+00 : f32
      %16 = vector.broadcast %cst_13 : f32 to vector<32x128xf32>
      %17 = arith.cmpf ogt, %15, %16 : vector<32x128xf32>
      %cst_14 = arith.constant 2.000000e-01 : f32
      %18 = vector.broadcast %cst_14 : f32 to vector<32x128xf32>
      %19 = arith.mulf %18, %15 : vector<32x128xf32>
      %20 = arith.select %17, %15, %19 : vector<32x128xi1>, vector<32x128xf32>
      %21 = arith.truncf %20 : vector<32x128xf32> to vector<32x128xbf16>
      %c0_15 = arith.constant 0 : index
      %c0_16 = arith.constant 0 : index
      %22 = vector.load %arg6[%c0_15, %c0_16] : memref<32x128xbf16, #tpu.memory_space<vmem>>, vector<32x128xbf16>
      tpu.vector_store %arg6[%c0_15, %c0_16], %21 {strides = array<i32>} : memref<32x128xbf16, #tpu.memory_space<vmem>>, vector<32x128xbf16>,
    } else {
    }
    return
  }
  func.func @transform_0(%arg0: i32, %arg1: i32, %arg2: i32) -> (i32, i32) {
    %c0_i32 = arith.constant 0 : i32
    return %arg0, %arg2 : i32, i32
  }
  func.func @transform_1(%arg0: i32, %arg1: i32, %arg2: i32) -> (i32, i32) {
    %c0_i32 = arith.constant 0 : i32
    return %arg2, %arg1 : i32, i32
  }
  func.func @transform_2(%arg0: i32, %arg1: i32, %arg2: i32) -> (i32, i32) {
    %c0_i32 = arith.constant 0 : i32
    %c0_i32_0 = arith.constant 0 : i32
    return %c0_i32, %arg1 : i32, i32
  }
  func.func @transform_3(%arg0: i32, %arg1: i32, %arg2: i32) -> (i32, i32) {
    %c0_i32 = arith.constant 0 : i32
    return %arg0, %arg1 : i32, i32
  }
}

module attributes {stable_mosaic.version = 11 : i64} {
  func.func @_matmul_bias_act_kernel(%arg0: i32, %arg1: i32, %arg2: i32, %arg3: memref<8x384xbf16, #tpu.memory_space<vmem>>, %arg4: memref<384x256xbf16, #tpu.memory_space<vmem>>, %arg5: memref<1x256xf32, #tpu.memory_space<vmem>>, %arg6: memref<8x256xbf16, #tpu.memory_space<vmem>>, %arg7: memref<8x256xf32, #tpu.memory_space<vmem>>) attributes {dimension_semantics = [#tpu.dimension_semantics<parallel>, #tpu.dimension_semantics<parallel>, #tpu.dimension_semantics<arbitrary>], iteration_bounds = array<i64: 1, 1, 3>, scalar_prefetch = 0 : i64, scratch_operands = 1 : i64, tpu.core_type = #tpu.core_type<tc>, window_params = [{transform_indices = @transform_0, window_bounds = array<i64: 8, 384>}, {transform_indices = @transform_1, window_bounds = array<i64: 384, 256>}, {transform_indices = @transform_2, window_bounds = array<i64: 1, 256>}, {transform_indices = @transform_3, window_bounds = array<i64: 8, 256>}]} {
    %c0_i32 = arith.constant 0 : i32
    %0 = arith.cmpi eq, %arg2, %c0_i32 : i32
    %1 = arith.extui %0 : i1 to i32
    %c0_i32_0 = arith.constant 0 : i32
    %2 = arith.cmpi ne, %1, %c0_i32_0 : i32
    scf.if %2 {
      %cst_9 = arith.constant 0.000000e+00 : f32
      %12 = vector.broadcast %cst_9 : f32 to vector<8x256xf32>
      %c0_10 = arith.constant 0 : index
      %c0_11 = arith.constant 0 : index
      %13 = vector.load %arg7[%c0_10, %c0_11] : memref<8x256xf32, #tpu.memory_space<vmem>>, vector<8x256xf32>
      tpu.vector_store %arg7[%c0_10, %c0_11], %12 {strides = array<i32>} : memref<8x256xf32, #tpu.memory_space<vmem>>, vector<8x256xf32>,
    } else {
    }
    %c0 = arith.constant 0 : index
    %c0_1 = arith.constant 0 : index
    %3 = vector.load %arg7[%c0, %c0_1] : memref<8x256xf32, #tpu.memory_space<vmem>>, vector<8x256xf32>
    %c0_2 = arith.constant 0 : index
    %c0_3 = arith.constant 0 : index
    %4 = vector.load %arg3[%c0_2, %c0_3] : memref<8x384xbf16, #tpu.memory_space<vmem>>, vector<8x384xbf16>
    %c0_4 = arith.constant 0 : index
    %c0_5 = arith.constant 0 : index
    %5 = vector.load %arg4[%c0_4, %c0_5] : memref<384x256xbf16, #tpu.memory_space<vmem>>, vector<384x256xbf16>
    %cst = arith.constant dense<0.000000e+00> : vector<8x256xf32>
    %6 = tpu.matmul %4, %5, %cst {dimension_numbers = #tpu.dot_dimension_numbers<[1], [0], [0], [1], [0, 0, 1, 1], [], []>} : vector<8x384xbf16>, vector<384x256xbf16>, vector<8x256xf32> -> vector<8x256xf32>
    %7 = arith.addf %3, %6 : vector<8x256xf32>
    %c0_6 = arith.constant 0 : index
    %c0_7 = arith.constant 0 : index
    %8 = vector.load %arg7[%c0_6, %c0_7] : memref<8x256xf32, #tpu.memory_space<vmem>>, vector<8x256xf32>
    tpu.vector_store %arg7[%c0_6, %c0_7], %7 {strides = array<i32>} : memref<8x256xf32, #tpu.memory_space<vmem>>, vector<8x256xf32>,
    %c2_i32 = arith.constant 2 : i32
    %9 = arith.cmpi eq, %arg2, %c2_i32 : i32
    %10 = arith.extui %9 : i1 to i32
    %c0_i32_8 = arith.constant 0 : i32
    %11 = arith.cmpi ne, %10, %c0_i32_8 : i32
    scf.if %11 {
      %c0_9 = arith.constant 0 : index
      %c0_10 = arith.constant 0 : index
      %12 = vector.load %arg7[%c0_9, %c0_10] : memref<8x256xf32, #tpu.memory_space<vmem>>, vector<8x256xf32>
      %c0_11 = arith.constant 0 : index
      %c0_12 = arith.constant 0 : index
      %13 = vector.load %arg5[%c0_11, %c0_12] : memref<1x256xf32, #tpu.memory_space<vmem>>, vector<1x256xf32>
      %14 = vector.broadcast %13 : vector<1x256xf32> to vector<8x256xf32>
      %15 = arith.addf %12, %14 : vector<8x256xf32>
      %cst_13 = arith.constant 0.000000e+00 : f32
      %16 = vector.broadcast %cst_13 : f32 to vector<8x256xf32>
      %17 = arith.cmpf ogt, %15, %16 : vector<8x256xf32>
      %cst_14 = arith.constant 2.000000e-01 : f32
      %18 = vector.broadcast %cst_14 : f32 to vector<8x256xf32>
      %19 = arith.mulf %18, %15 : vector<8x256xf32>
      %20 = arith.select %17, %15, %19 : vector<8x256xi1>, vector<8x256xf32>
      %21 = arith.truncf %20 : vector<8x256xf32> to vector<8x256xbf16>
      %c0_15 = arith.constant 0 : index
      %c0_16 = arith.constant 0 : index
      %22 = vector.load %arg6[%c0_15, %c0_16] : memref<8x256xbf16, #tpu.memory_space<vmem>>, vector<8x256xbf16>
      tpu.vector_store %arg6[%c0_15, %c0_16], %21 {strides = array<i32>} : memref<8x256xbf16, #tpu.memory_space<vmem>>, vector<8x256xbf16>,
    } else {
    }
    return
  }
  func.func @transform_0(%arg0: i32, %arg1: i32, %arg2: i32) -> (i32, i32) {
    %c0_i32 = arith.constant 0 : i32
    return %arg0, %arg2 : i32, i32
  }
  func.func @transform_1(%arg0: i32, %arg1: i32, %arg2: i32) -> (i32, i32) {
    %c0_i32 = arith.constant 0 : i32
    return %arg2, %arg1 : i32, i32
  }
  func.func @transform_2(%arg0: i32, %arg1: i32, %arg2: i32) -> (i32, i32) {
    %c0_i32 = arith.constant 0 : i32
    %c0_i32_0 = arith.constant 0 : i32
    return %c0_i32, %arg1 : i32, i32
  }
  func.func @transform_3(%arg0: i32, %arg1: i32, %arg2: i32) -> (i32, i32) {
    %c0_i32 = arith.constant 0 : i32
    return %arg0, %arg1 : i32, i32
  }
}

module attributes {stable_mosaic.version = 11 : i64} {
  func.func @_matmul_bias_act_kernel(%arg0: i32, %arg1: i32, %arg2: i32, %arg3: memref<8x384xbf16, #tpu.memory_space<vmem>>, %arg4: memref<384x256xbf16, #tpu.memory_space<vmem>>, %arg5: memref<1x256xf32, #tpu.memory_space<vmem>>, %arg6: memref<8x256xbf16, #tpu.memory_space<vmem>>, %arg7: memref<8x256xf32, #tpu.memory_space<vmem>>) attributes {dimension_semantics = [#tpu.dimension_semantics<parallel>, #tpu.dimension_semantics<parallel>, #tpu.dimension_semantics<arbitrary>], iteration_bounds = array<i64: 1, 2, 6>, scalar_prefetch = 0 : i64, scratch_operands = 1 : i64, tpu.core_type = #tpu.core_type<tc>, window_params = [{transform_indices = @transform_0, window_bounds = array<i64: 8, 384>}, {transform_indices = @transform_1, window_bounds = array<i64: 384, 256>}, {transform_indices = @transform_2, window_bounds = array<i64: 1, 256>}, {transform_indices = @transform_3, window_bounds = array<i64: 8, 256>}]} {
    %c0_i32 = arith.constant 0 : i32
    %0 = arith.cmpi eq, %arg2, %c0_i32 : i32
    %1 = arith.extui %0 : i1 to i32
    %c0_i32_0 = arith.constant 0 : i32
    %2 = arith.cmpi ne, %1, %c0_i32_0 : i32
    scf.if %2 {
      %cst_9 = arith.constant 0.000000e+00 : f32
      %12 = vector.broadcast %cst_9 : f32 to vector<8x256xf32>
      %c0_10 = arith.constant 0 : index
      %c0_11 = arith.constant 0 : index
      %13 = vector.load %arg7[%c0_10, %c0_11] : memref<8x256xf32, #tpu.memory_space<vmem>>, vector<8x256xf32>
      tpu.vector_store %arg7[%c0_10, %c0_11], %12 {strides = array<i32>} : memref<8x256xf32, #tpu.memory_space<vmem>>, vector<8x256xf32>,
    } else {
    }
    %c0 = arith.constant 0 : index
    %c0_1 = arith.constant 0 : index
    %3 = vector.load %arg7[%c0, %c0_1] : memref<8x256xf32, #tpu.memory_space<vmem>>, vector<8x256xf32>
    %c0_2 = arith.constant 0 : index
    %c0_3 = arith.constant 0 : index
    %4 = vector.load %arg3[%c0_2, %c0_3] : memref<8x384xbf16, #tpu.memory_space<vmem>>, vector<8x384xbf16>
    %c0_4 = arith.constant 0 : index
    %c0_5 = arith.constant 0 : index
    %5 = vector.load %arg4[%c0_4, %c0_5] : memref<384x256xbf16, #tpu.memory_space<vmem>>, vector<384x256xbf16>
    %cst = arith.constant dense<0.000000e+00> : vector<8x256xf32>
    %6 = tpu.matmul %4, %5, %cst {dimension_numbers = #tpu.dot_dimension_numbers<[1], [0], [0], [1], [0, 0, 1, 1], [], []>} : vector<8x384xbf16>, vector<384x256xbf16>, vector<8x256xf32> -> vector<8x256xf32>
    %7 = arith.addf %3, %6 : vector<8x256xf32>
    %c0_6 = arith.constant 0 : index
    %c0_7 = arith.constant 0 : index
    %8 = vector.load %arg7[%c0_6, %c0_7] : memref<8x256xf32, #tpu.memory_space<vmem>>, vector<8x256xf32>
    tpu.vector_store %arg7[%c0_6, %c0_7], %7 {strides = array<i32>} : memref<8x256xf32, #tpu.memory_space<vmem>>, vector<8x256xf32>,
    %c5_i32 = arith.constant 5 : i32
    %9 = arith.cmpi eq, %arg2, %c5_i32 : i32
    %10 = arith.extui %9 : i1 to i32
    %c0_i32_8 = arith.constant 0 : i32
    %11 = arith.cmpi ne, %10, %c0_i32_8 : i32
    scf.if %11 {
      %c0_9 = arith.constant 0 : index
      %c0_10 = arith.constant 0 : index
      %12 = vector.load %arg7[%c0_9, %c0_10] : memref<8x256xf32, #tpu.memory_space<vmem>>, vector<8x256xf32>
      %c0_11 = arith.constant 0 : index
      %c0_12 = arith.constant 0 : index
      %13 = vector.load %arg5[%c0_11, %c0_12] : memref<1x256xf32, #tpu.memory_space<vmem>>, vector<1x256xf32>
      %14 = vector.broadcast %13 : vector<1x256xf32> to vector<8x256xf32>
      %15 = arith.addf %12, %14 : vector<8x256xf32>
      %cst_13 = arith.constant 0.000000e+00 : f32
      %16 = vector.broadcast %cst_13 : f32 to vector<8x256xf32>
      %17 = arith.cmpf ogt, %15, %16 : vector<8x256xf32>
      %cst_14 = arith.constant 2.000000e-01 : f32
      %18 = vector.broadcast %cst_14 : f32 to vector<8x256xf32>
      %19 = arith.mulf %18, %15 : vector<8x256xf32>
      %20 = arith.select %17, %15, %19 : vector<8x256xi1>, vector<8x256xf32>
      %21 = arith.truncf %20 : vector<8x256xf32> to vector<8x256xbf16>
      %c0_15 = arith.constant 0 : index
      %c0_16 = arith.constant 0 : index
      %22 = vector.load %arg6[%c0_15, %c0_16] : memref<8x256xbf16, #tpu.memory_space<vmem>>, vector<8x256xbf16>
      tpu.vector_store %arg6[%c0_15, %c0_16], %21 {strides = array<i32>} : memref<8x256xbf16, #tpu.memory_space<vmem>>, vector<8x256xbf16>,
    } else {
    }
    return
  }
  func.func @transform_0(%arg0: i32, %arg1: i32, %arg2: i32) -> (i32, i32) {
    %c0_i32 = arith.constant 0 : i32
    return %arg0, %arg2 : i32, i32
  }
  func.func @transform_1(%arg0: i32, %arg1: i32, %arg2: i32) -> (i32, i32) {
    %c0_i32 = arith.constant 0 : i32
    return %arg2, %arg1 : i32, i32
  }
  func.func @transform_2(%arg0: i32, %arg1: i32, %arg2: i32) -> (i32, i32) {
    %c0_i32 = arith.constant 0 : i32
    %c0_i32_0 = arith.constant 0 : i32
    return %c0_i32, %arg1 : i32, i32
  }
  func.func @transform_3(%arg0: i32, %arg1: i32, %arg2: i32) -> (i32, i32) {
    %c0_i32 = arith.constant 0 : i32
    return %arg0, %arg1 : i32, i32
  }
}

module attributes {stable_mosaic.version = 11 : i64} {
  func.func @_matmul_bias_act_kernel(%arg0: i32, %arg1: i32, %arg2: i32, %arg3: memref<8x512xbf16, #tpu.memory_space<vmem>>, %arg4: memref<512x128xbf16, #tpu.memory_space<vmem>>, %arg5: memref<1x128xf32, #tpu.memory_space<vmem>>, %arg6: memref<8x128xf32, #tpu.memory_space<vmem>>, %arg7: memref<8x128xf32, #tpu.memory_space<vmem>>) attributes {dimension_semantics = [#tpu.dimension_semantics<parallel>, #tpu.dimension_semantics<parallel>, #tpu.dimension_semantics<arbitrary>], iteration_bounds = array<i64: 1, 1, 9>, scalar_prefetch = 0 : i64, scratch_operands = 1 : i64, tpu.core_type = #tpu.core_type<tc>, window_params = [{transform_indices = @transform_0, window_bounds = array<i64: 8, 512>}, {transform_indices = @transform_1, window_bounds = array<i64: 512, 128>}, {transform_indices = @transform_2, window_bounds = array<i64: 1, 128>}, {transform_indices = @transform_3, window_bounds = array<i64: 8, 128>}]} {
    %c0_i32 = arith.constant 0 : i32
    %0 = arith.cmpi eq, %arg2, %c0_i32 : i32
    %1 = arith.extui %0 : i1 to i32
    %c0_i32_0 = arith.constant 0 : i32
    %2 = arith.cmpi ne, %1, %c0_i32_0 : i32
    scf.if %2 {
      %cst_9 = arith.constant 0.000000e+00 : f32
      %12 = vector.broadcast %cst_9 : f32 to vector<8x128xf32>
      %c0_10 = arith.constant 0 : index
      %c0_11 = arith.constant 0 : index
      %13 = vector.load %arg7[%c0_10, %c0_11] : memref<8x128xf32, #tpu.memory_space<vmem>>, vector<8x128xf32>
      tpu.vector_store %arg7[%c0_10, %c0_11], %12 {strides = array<i32>} : memref<8x128xf32, #tpu.memory_space<vmem>>, vector<8x128xf32>,
    } else {
    }
    %c0 = arith.constant 0 : index
    %c0_1 = arith.constant 0 : index
    %3 = vector.load %arg7[%c0, %c0_1] : memref<8x128xf32, #tpu.memory_space<vmem>>, vector<8x128xf32>
    %c0_2 = arith.constant 0 : index
    %c0_3 = arith.constant 0 : index
    %4 = vector.load %arg3[%c0_2, %c0_3] : memref<8x512xbf16, #tpu.memory_space<vmem>>, vector<8x512xbf16>
    %c0_4 = arith.constant 0 : index
    %c0_5 = arith.constant 0 : index
    %5 = vector.load %arg4[%c0_4, %c0_5] : memref<512x128xbf16, #tpu.memory_space<vmem>>, vector<512x128xbf16>
    %cst = arith.constant dense<0.000000e+00> : vector<8x128xf32>
    %6 = tpu.matmul %4, %5, %cst {dimension_numbers = #tpu.dot_dimension_numbers<[1], [0], [0], [1], [0, 0, 1, 1], [], []>} : vector<8x512xbf16>, vector<512x128xbf16>, vector<8x128xf32> -> vector<8x128xf32>
    %7 = arith.addf %3, %6 : vector<8x128xf32>
    %c0_6 = arith.constant 0 : index
    %c0_7 = arith.constant 0 : index
    %8 = vector.load %arg7[%c0_6, %c0_7] : memref<8x128xf32, #tpu.memory_space<vmem>>, vector<8x128xf32>
    tpu.vector_store %arg7[%c0_6, %c0_7], %7 {strides = array<i32>} : memref<8x128xf32, #tpu.memory_space<vmem>>, vector<8x128xf32>,
    %c8_i32 = arith.constant 8 : i32
    %9 = arith.cmpi eq, %arg2, %c8_i32 : i32
    %10 = arith.extui %9 : i1 to i32
    %c0_i32_8 = arith.constant 0 : i32
    %11 = arith.cmpi ne, %10, %c0_i32_8 : i32
    scf.if %11 {
      %c0_9 = arith.constant 0 : index
      %c0_10 = arith.constant 0 : index
      %12 = vector.load %arg7[%c0_9, %c0_10] : memref<8x128xf32, #tpu.memory_space<vmem>>, vector<8x128xf32>
      %c0_11 = arith.constant 0 : index
      %c0_12 = arith.constant 0 : index
      %13 = vector.load %arg5[%c0_11, %c0_12] : memref<1x128xf32, #tpu.memory_space<vmem>>, vector<1x128xf32>
      %14 = vector.broadcast %13 : vector<1x128xf32> to vector<8x128xf32>
      %15 = arith.addf %12, %14 : vector<8x128xf32>
      %c0_13 = arith.constant 0 : index
      %c0_14 = arith.constant 0 : index
      %16 = vector.load %arg6[%c0_13, %c0_14] : memref<8x128xf32, #tpu.memory_space<vmem>>, vector<8x128xf32>
      tpu.vector_store %arg6[%c0_13, %c0_14], %15 {strides = array<i32>} : memref<8x128xf32, #tpu.memory_space<vmem>>, vector<8x128xf32>,
    } else {
    }
    return
  }
  func.func @transform_0(%arg0: i32, %arg1: i32, %arg2: i32) -> (i32, i32) {
    %c0_i32 = arith.constant 0 : i32
    return %arg0, %arg2 : i32, i32
  }
  func.func @transform_1(%arg0: i32, %arg1: i32, %arg2: i32) -> (i32, i32) {
    %c0_i32 = arith.constant 0 : i32
    return %arg2, %arg1 : i32, i32
  }
  func.func @transform_2(%arg0: i32, %arg1: i32, %arg2: i32) -> (i32, i32) {
    %c0_i32 = arith.constant 0 : i32
    %c0_i32_0 = arith.constant 0 : i32
    return %c0_i32, %arg1 : i32, i32
  }
  func.func @transform_3(%arg0: i32, %arg1: i32, %arg2: i32) -> (i32, i32) {
    %c0_i32 = arith.constant 0 : i32
    return %arg0, %arg1 : i32, i32
  }
}

</mosaic_0001>

<bundles_post_ra>
// kernel: discriminator_forward.6
= control target key start
LH: loop header
LB: loop body
LE: loop exit
PB: predicated region body
PF: predicated region fallthrough
CT: control target
= control target key end

     0   :  { %8 = vsyncpa [#allocation5], 0  ;;  %s1112_s0 = inlined_call_operand.vmem [shape: bf16[32,640], index: 0, kind: input, shape index: {}]   ;;  %s1113_s1 = inlined_call_operand.hbm [shape: bf16[640,128], index: 1, kind: input, shape index: {}]   ;;  %s1114_s2 = inlined_call_operand.hbm [shape: f32[1,128], index: 2, kind: input, shape index: {}]   ;;  %s1115_s3 = inlined_call_operand.vmem [shape: bf16[32,128], index: 3, kind: output, shape index: {}]  }
   0x1   :  { %10 = vsyncpa [#allocation5 + $0x1], 0 }
   0x2   :  { %11 = vsyncpa [#allocation7], 0  ;;  %s934_s12 = smov 0   ;;  %s936_s13 = smov 0  }
   0x3   :  { %s938_s14 = smov 0   ;;  %s940_s15 = smov 0  }
   0x4   :  { %s942_s16 = smov 0   ;;  %s944_s17 = smov 0  }
   0x5 LB: > { %s643_s18 = sadd.s32 4294967295, %s907_s17   ;;  %s29_s19 = sadd.s32 1, %s903_s16  ;;  %s907_s17 = sphi %s944_s17, %s17_s17   ;;  %s903_s16 = sphi %s942_s16, %s1135_s16   ;;  %s899_s15 = sphi %s940_s15, %s1134_s15   ;;  %s895_s14 = sphi %s938_s14, %s1133_s14   ;;  %s891_s13 = sphi %s936_s13, %s1132_s13   ;;  %s887_s12 = sphi %s934_s12, %s1131_s12  }
   0x6   : > { %p30_p0 = scmp.ge.s32.totalorder %s29_s19, 5  ;;  %s45_s20 = sadd.s32 1, %s895_s14 }
   0x7   : > { %p52_p1 = scmp.ne.s32.totalorder %s895_s14, %s891_s13  ;;  %p53_p2 = scmp.eq.s32.totalorder %s907_s17, 0 }
   0x8   : > { %s1137_s19 = smov (%p30_p0, %s29_s19), 0  ;;  %p86_p4 = scmp.ne.s32.totalorder %s891_s13, %s887_s12 }
   0x9   : > { %p970_p3 = por %p53_p2, %p52_p1  ;;  %s41_s22 = ssub.s32 %s903_s16, %s1137_s19 }
   0xa   : > { %p977_p5 = scmp.eq.s32.totalorder %s643_s18, 0  ;;  %p43_p6 = scmp.eq.s32.totalorder %s41_s22, 0 }
   0xb   : > { %s1121_s21 = scalar_select %p970_p3, 1, 0 }
   0xc   : > { %s1122_s23 = scalar_select %p977_p5, 1, 0 }
   0xd   : > { %p644_p7 = scmp.ge.s32.totalorder %s907_s17, 1  ;;  %p984_p8 = por %p977_p5, %p86_p4 }
   0xe   : > { %p151_p9 = scmp.lt.s32.totalorder %s907_s17, 6  ;;  %s909_s27 = smov [#allocation6]  }
   0xf   : > { %s1123_s24 = scalar_select %p984_p8, 1, 0 }
  0x10   : > { %s990_s25 = scalar_select %p43_p6, %s895_s14, %s45_s20  }
  0x11   : > { %p992_p10 = pnand %p644_p7, %p151_p9  ;;  %s166_s28 = sshll.u32 %s909_s27, 4  ;;  %s167_s28 = int_to_ptr.vmem [resolvable:$true] %s166_s28 }
  0x12   : > { %s797_s5 = scalar_lea.hbm %s1114_s2, 16 }
  0x13   : > { %s1124_s26 = scalar_select %p992_p10, 1, 0 }
  0x14   : > { %p729_p11 = pneg %p992_p10  ;;  %p798_p13 = scmp.ne.s32.totalorder %s1114_s2, %s797_s5 }
  0x15   : > { %p804_p4 = scmp.lt.u32.totalorder %s797_s5, %s1114_s2 }
  0x16   : > { %p1000_p12 = pnand %p729_p11, %p977_p5 }
  0x18   : > { %p799_p0 = pneg %p1000_p12 }
  0x1a   : > { %p800_p1 = pnand %p799_p0, %p798_p13 }
  0x1c   : > { %p801_p2 = pneg %p800_p1 }
  0x1e   : > { %p806_p6 = pnand %p804_p4, %p801_p2 }
  0x20   : > { %809 = shalt.err (!%p806_p6)
}
  0x21   : > { %s810_s10 = scalar_lea.vmem %s167_s28, 16  ;;  %s817_s11 = scalar_lea.vmem %s167_s28, 32 }
  0x22   : > { %p811_p7 = scmp.ne.s32.totalorder %s167_s28, %s810_s10  ;;  %p818_p5 = scmp.lt.s32.totalorder %s167_s28, %s167_s28 }
  0x23   : > { %p819_p8 = scmp.lt.s32.totalorder %s817_s11, %s810_s10 }
  0x24   : > { %p813_p9 = pnand %p811_p7, %p799_p0 }
  0x25   : > { %p820_p10 = por %p819_p8, %p818_p5 }
  0x26   : > { %p814_p11 = pneg %p813_p9 }
  0x28   : > { %p821_p3 = pnand %p820_p10, %p814_p11 }
  0x2a   : > { %824 = shalt.err (!%p821_p3)
}
  0x2b   : > { %732 = dma.hbm_to_vmem [thread:$0]  (!%p1000_p12), %s1114_s2, 16, %s167_s28, [#allocation7]  }
  0x2c   : > { %p646_p13 = scmp.ge.s32.totalorder %s907_s17, 5 }
  0x2d   : > { %p1126_p1 = scmp.ne.s32.totalorder (!%p646_p13), %s1121_s21, 0 }
  0x2e   : > { %173 = sbr.rel (%p646_p13) target bundleno = 87 (0x57), region = 20 }
  0x35   : > { %176 = sbr.rel (!%p1126_p1) target bundleno = 60 (0x3c), region = 24  ;;  %s178_s20 = sand.u32 (%p1126_p1), 1, %s895_s14  }
  0x36   : > { %s648_s22 = sshll.u32 (%p1126_p1), %s903_s16, 2  ;;  %s647_s27 = sshll.u32 (%p1126_p1), %s178_s20, 4 }
  0x37   : > { %s185_s5 = scalar_lea.vmem (%p1126_p1), %s1112_s0, %s648_s22  ;;  %s180_s29 = scalar_lea.vmem (%p1126_p1), [#allocation3], %s647_s27 }
  0x38   : > { %v201_v0 = vld [vmem:[%s185_s5] sm:$0xf] (%p1126_p1)  ;;  %v203_v1 = vld [vmem:[%s185_s5 + $0x14] sm:$0xf] (%p1126_p1)  ;;  %v205_v2 = vld [vmem:[%s185_s5 + $0x28] sm:$0xf] (%p1126_p1) }
  0x39   : > { %202 = vst [vmem:[%s180_s29] sm:$0xf] (%p1126_p1), %v201_v0  ;;  %204 = vst [vmem:[%s180_s29 + $0x4] sm:$0xf] (%p1126_p1), %v203_v1  ;;  %v207_v3 = vld [vmem:[%s185_s5 + $0x3c] sm:$0xf] (%p1126_p1) }
  0x3a   : > { %206 = vst [vmem:[%s180_s29 + $0x8] sm:$0xf] (%p1126_p1), %v205_v2  ;;  %208 = vst [vmem:[%s180_s29 + $0xc] sm:$0xf] (%p1126_p1), %v207_v3 }
  0x3c PF: > { %s240_s28 = sand.u32 1, %s895_s14   ;;  %s677_s6 = sshll.u32 %s903_s16, 10 }
  0x3d   : > { %s649_s7 = sshll.u32 %s240_s28, 6  ;;  %s1033_s10 = scalar_lea.hbm %s1113_s1, %s677_s6 }
  0x3e   : > { %s244_s11 = scalar_lea.vmem [#allocation4], %s649_s7  ;;  %s1037_s18 = scalar_lea.sflag [#allocation5], %s240_s28 }
  0x3f   : > { %s252_s12 = sshll.u32 %s244_s11, 4  ;;  %s825_s20 = scalar_lea.hbm %s1033_s10, 1024  ;;  %s1035_s12 = int_to_ptr.vmem [resolvable:$true] %s252_s12 }
  0x40   : > { %p826_p3 = scmp.ne.s32.totalorder %s1033_s10, %s825_s20  ;;  %p1127_p5 = scmp.ne.s32.totalorder %s1121_s21, 0 }
  0x41   : > { %s829_s30 = scalar_lea.hbm %s1113_s1, 5120  ;;  %p830_p12 = scmp.lt.u32.totalorder %s1033_s10, %s1113_s1 }
  0x42   : > { %p827_p8 = pnand %p826_p3, %p1127_p5  ;;  %p831_p0 = scmp.lt.u32.totalorder %s829_s30, %s825_s20 }
  0x43   : > { %p833_p4 = scmp.lt.u32.totalorder %s825_s20, %s1033_s10 }
  0x44   : > { %p828_p10 = pneg %p827_p8  ;;  %p832_p2 = por %p831_p0, %p830_p12 }
  0x46   : > { %p834_p6 = por %p833_p4, %p832_p2 }
  0x48   : > { %p835_p7 = pnand %p834_p6, %p828_p10 }
  0x4a   : > { %838 = shalt.err (!%p835_p7)
}
  0x4b   : > { %s839_s29 = scalar_lea.vmem %s1035_s12, 1024  ;;  %s910_s28 = smov [#allocation4]  }
  0x4c   : > { %p840_p9 = scmp.ne.s32.totalorder %s1035_s12, %s839_s29  ;;  %s843_s6 = sshll.u32 %s910_s28, 4  ;;  %s844_s6 = int_to_ptr.vmem [resolvable:$false] %s843_s6 }
  0x4d   : > { %s845_s7 = scalar_lea.vmem %s844_s6, 2048  ;;  %p846_p1 = scmp.lt.s32.totalorder %s1035_s12, %s844_s6 }
  0x4e   : > { %p841_p11 = pnand %p840_p9, %p1127_p5  ;;  %p847_p3 = scmp.lt.s32.totalorder %s845_s7, %s839_s29 }
  0x50   : > { %p842_p13 = pneg %p841_p11  ;;  %p848_p8 = por %p847_p3, %p846_p1 }
  0x52   : > { %p849_p12 = pnand %p848_p8, %p842_p13 }
  0x54   : > { %852 = shalt.err (!%p849_p12)
}
  0x55   : > { %s911_s8 = smov 64   ;;  %s912_s9 = smov 4  }
  0x56   : > { %725 = dma.hbm_to_vmem [thread:$0]  (%p1127_p5), %s1033_s10, 1024, %s1035_s12, %s1037_s18, %s911_s8, %s911_s8, %s912_s9  }
  0x57 PF: > { %p1128_p10 = scmp.ne.s32.totalorder %s1124_s26, 0 }
  0x58   : > { %s267_s11 = sand.u32 (!%p1128_p10), 1, %s891_s13   ;;  %p1129_p0 = scmp.ne.s32.totalorder (!%p1128_p10), %s1123_s24, 0 }
  0x59   : > { %264 = sbr.rel (%p1128_p10) target bundleno = 375 (0x177), region = 69  ;;  %s653_s20 = sshll.u32 (!%p1128_p10), %s267_s11, 4 }
  0x5a   : > { %s654_s22 = sshll.u32 (!%p1128_p10), %s267_s11, 6  ;;  %s1064_s27 = scalar_lea.vmem (!%p1128_p10), [#allocation3], %s653_s20 }
  0x5b   : > { %s274_s30 = scalar_lea.sflag (!%p1128_p10), [#allocation5], %s267_s11  ;;  %s1066_s4 = scalar_lea.vmem (!%p1128_p10), [#allocation4], %s654_s22 }
  0x60   : > { %878 = dma.done.wait (%p1129_p0), %s274_s30, 1024  }
  0x61   : > { %880 = vsyncadd (%p1129_p0), %s274_s30, 4294966272  ;;  %p1130_p5 = scmp.ne.s32.totalorder %s1122_s23, 0 }
  0x63   : > { %882 = dma.done.wait (%p1130_p5), [#allocation7], 16  }
  0x64   : > { %884 = vsyncadd (%p1130_p5), [#allocation7], 4294967280  ;;  %p656_p2 = scmp.ne.s32.totalorder %s899_s15, 0 }
  0x65   : > { %v913_v4 = vmov (!%p656_p2), 0.0  }
  0x66   : > { %326 = sbr.rel (%p656_p2) target bundleno = 109 (0x6d), region = 85  ;;  %327 = vst [vmem:[#allocation2] sm:$0xff] (!%p656_p2), %v913_v4  ;;  %328 = vst [vmem:[#allocation2 + $0x8] sm:$0xff] (!%p656_p2), %v913_v4 }
  0x67   : > { %329 = vst [vmem:[#allocation2 + $0x10] sm:$0xff] (!%p656_p2), %v913_v4  ;;  %330 = vst [vmem:[#allocation2 + $0x18] sm:$0xff] (!%p656_p2), %v913_v4 }
  0x6d PF: > { %v787_v5 = vld [vmem:[%s1066_s4] sm:$0xff]   ;;  %v788_v6 = vld [vmem:[%s1066_s4 + $0x8] sm:$0xff]   ;;  %v789_v7 = vld [vmem:[%s1066_s4 + $0x10] sm:$0xff]   ;;  %p667_p4 = scmp.ne.s32.totalorder %s899_s15, 4 }
  0x6e   : > { %703 = vmatprep.subr.bf16.mxu0 %v787_v5  ;;  %v790_v8 = vld [vmem:[%s1066_s4 + $0x18] sm:$0xff]   ;;  %v795_v9 = vld [vmem:[%s1064_s27] sm:$0xff]   ;;  %v792_v11 = vld [vmem:[%s1066_s4 + $0x28] sm:$0xff]  }
  0x6f   : > { %704 = vmatpush3.bf16.msra.mxu0 %v787_v5  ;;  %719 = vmatprep.mubr.bf16.mxu0 %v795_v9  ;;  %v791_v10 = vld [vmem:[%s1066_s4 + $0x20] sm:$0xff]   ;;  %v793_v12 = vld [vmem:[%s1066_s4 + $0x30] sm:$0xff]   ;;  %v794_v13 = vld [vmem:[%s1066_s4 + $0x38] sm:$0xff]  }
  0x70   : > { %705 = vmatprep.subr.bf16.mxu0 %v788_v6  ;;  %v796_v14 = vld [vmem:[%s1064_s27 + $0x8] sm:$0xff]   ;;  %v333_v15 = vld [vmem:[#allocation2 + $0x10] sm:$0xff]  ;;  %v331_v16 = vld [vmem:[#allocation2] sm:$0xff] }
  0x71   : > { %v334_v18 = vld [vmem:[#allocation2 + $0x18] sm:$0xff]  ;;  %v332_v21 = vld [vmem:[#allocation2 + $0x8] sm:$0xff]  ;;  %v668_v29 = vld [vmem:[#allocation6] ss:$0 sm:$0xff] (!%p667_p4) }
  0x73   : > { %706 = vmatpush3.bf16.msra.mxu0 %v788_v6 }
  0x74   : > { %707 = vmatprep.subr.bf16.mxu0 %v789_v7 }
  0x77   : > { %708 = vmatpush3.bf16.msra.mxu0 %v789_v7 }
  0x78   : > { %709 = vmatprep.subr.bf16.mxu0 %v790_v8 }
  0x7b   : > { %710 = vmatpush3.bf16.msra.mxu0 %v790_v8 }
  0x7c   : > { %711 = vmatprep.subr.bf16.mxu0 %v791_v10 }
  0x7f   : > { %712 = vmatpush3.bf16.msra.mxu0 %v791_v10 }
  0x80   : > { %713 = vmatprep.subr.bf16.mxu0 %v792_v11 }
  0x83   : > { %714 = vmatpush3.bf16.msra.mxu0 %v792_v11 }
  0x84   : > { %715 = vmatprep.subr.bf16.mxu0 %v793_v12 }
  0x87   : > { %716 = vmatpush3.bf16.msra.mxu0 %v793_v12 }
  0x88   : > { %717 = vmatprep.subr.bf16.mxu0 %v794_v13 }
  0x8b   : > { %718 = vmatpush3.bf16.msra.mxu0 %v794_v13 }
  0x8e   : > { %720 = vmatmul.mubr.bf16.vlgmr.msra.gmra.mrb[0].mxu0 %v796_v14 }
 0x161   : > { %v721_v17 = vpop.f32.mrb[0].mxu0  ;;  %475 = sbr.rel (%p667_p4) target bundleno = 375 (0x177), region = 89 }
 0x162   : > { %v466_v19 = vadd.f32 %v721_v17, %v333_v15  ;;  %v449_v20 = vpop.f32.mrb[1].mxu0 }
 0x163   : > { %v464_v22 = vadd.f32 %v449_v20, %v331_v16  ;;  %v722_v23 = vpop.f32.mrb[2].mxu0 }
 0x164   : > { %470 = vst [vmem:[#allocation2 + $0x10] sm:$0xff] %v466_v19  ;;  %v467_v24 = vadd.f32 %v722_v23, %v334_v18  ;;  %v452_v25 = vpop.f32.mrb[3].mxu0 }
 0x165   : > { %468 = vst [vmem:[#allocation2] sm:$0xff] %v464_v22  ;;  %v465_v26 = vadd.f32 %v452_v25, %v332_v21 }
 0x166   : > { %471 = vst [vmem:[#allocation2 + $0x18] sm:$0xff] %v467_v24 }
 0x167   : > { %469 = vst [vmem:[#allocation2 + $0x8] sm:$0xff] %v465_v26 }
 0x16b   : > { %v478_v32 = vld [vmem:[#allocation2 + $0x10] sm:$0xff] }
 0x16c   : > { %v476_v27 = vld [vmem:[#allocation2] sm:$0xff]  ;;  %v489_v34 = vadd.f32 %v668_v29, %v478_v32 }
 0x16d   : > { %v487_v30 = vadd.f32 %v668_v29, %v476_v27  ;;  %v479_v33 = vld [vmem:[#allocation2 + $0x18] sm:$0xff] }
 0x16e   : > { %v477_v28 = vld [vmem:[#allocation2 + $0x8] sm:$0xff]  ;;  %v490_v35 = vadd.f32 %v668_v29, %v479_v33  ;;  %vm493_vm2 = vcmp.gt.f32.partialorder %v489_v34, 0.0  ;;  %v497_v38 = vmul.f32 0.2, %v489_v34 }
 0x16f   : > { %v488_v31 = vadd.f32 %v668_v29, %v477_v28  ;;  %vm491_vm0 = vcmp.gt.f32.partialorder %v487_v30, 0.0  ;;  %v495_v36 = vmul.f32 0.2, %v487_v30 }
 0x170   : > { %vm494_vm3 = vcmp.gt.f32.partialorder %v490_v35, 0.0  ;;  %v498_v39 = vmul.f32 0.2, %v490_v35  ;;  %v501_v43 = vsel %vm493_vm2, %v489_v34, %v497_v38 }
 0x171   : > { %vm492_vm1 = vcmp.gt.f32.partialorder %v488_v31, 0.0  ;;  %v496_v37 = vmul.f32 0.2, %v488_v31  ;;  %v499_v40 = vsel %vm491_vm0, %v487_v30, %v495_v36 }
 0x172   : > { %v502_v44 = vsel %vm494_vm3, %v490_v35, %v498_v39 }
 0x173   : > { %v500_v41 = vsel %vm492_vm1, %v488_v31, %v496_v37  ;;  %v690_v45 = vpack.c.bf16 %v502_v44, %v501_v43 }
 0x174   : > { %v685_v42 = vpack.c.bf16 %v500_v41, %v499_v40 }
 0x175   : > { %692 = vst [vmem:[%s1115_s3 + $0x8] sm:$0xff] %v690_v45  }
 0x176   : > { %686 = vst [vmem:[%s1115_s3] sm:$0xff] %v685_v42  }
 0x177 PF: > { %s17_s17 = sadd.s32 1, %s907_s17   ;;  %s1131_s12 = smov %s891_s13 }
 0x178   : > { %p14_p6 = scmp.ge.s32.totalorder %s17_s17, 7   ;;  %s1132_s13 = smov %s895_s14 }
 0x179   : > { %s1133_s14 = smov %s990_s25  ;;  %s1134_s15 = smov %s903_s16 }
 0x17a   : > { %s1135_s16 = smov %s1137_s19  ;;  %16 = sbr.rel (!%p14_p6) target bundleno = 5 (0x5), region = 134 }
 0x181   :  { %551 = vsyncpa [#allocation5], 1 }
 0x182   :  { %553 = vsyncpa [#allocation5 + $0x1], 1 }
 0x183   :  { %554 = vsyncpa [#allocation7], 1 }

// kernel: discriminator_forward.5
= control target key start
LH: loop header
LB: loop body
LE: loop exit
PB: predicated region body
PF: predicated region fallthrough
CT: control target
= control target key end

     0   :  { %8 = vsyncpa [#allocation4], 0  ;;  %s856_s0 = inlined_call_operand.vmem [shape: bf16[128,128], index: 0, kind: input, shape index: {}]   ;;  %s857_s1 = inlined_call_operand.hbm [shape: bf16[128,128], index: 1, kind: input, shape index: {}]   ;;  %s858_s2 = inlined_call_operand.hbm [shape: f32[1,128], index: 2, kind: input, shape index: {}]   ;;  %s859_s3 = inlined_call_operand.vmem [shape: bf16[128,128], index: 3, kind: output, shape index: {}]  }
   0x1   :  { %9 = vsyncpa [#allocation6], 0  ;;  %s738_s12 = smov [#allocation3]   ;;  %s690_s16 = scalar_lea.hbm %s857_s1, 1024 }
   0x2   :  { %s17_s13 = sshll.u32 %s738_s12, 4  ;;  %p691_p0 = scmp.ne.s32.totalorder %s857_s1, %s690_s16  ;;  %s18_s13 = int_to_ptr.vmem [resolvable:$true] %s17_s13 }
   0x3   :  { %p694_p1 = scmp.lt.u32.totalorder %s690_s16, %s857_s1 }
   0x5   :  { %p696_p2 = pnand %p694_p1, %p691_p0 }
   0x7   :  { %699 = shalt.err (!%p696_p2)
}
   0x8   :  { %s700_s21 = scalar_lea.vmem %s18_s13, 1024  ;;  %p705_p4 = scmp.lt.s32.totalorder %s18_s13, %s18_s13 }
   0x9   :  { %p701_p3 = scmp.ne.s32.totalorder %s18_s13, %s700_s21  ;;  %p706_p5 = scmp.lt.s32.totalorder %s700_s21, %s700_s21 }
   0xb   :  { %p707_p6 = por %p706_p5, %p705_p4 }
   0xd   :  { %p708_p7 = pnand %p707_p6, %p701_p3 }
   0xf   :  { %711 = shalt.err (!%p708_p7)
}
  0x10   :  { %s739_s22 = smov 64   ;;  %s740_s23 = smov 4  }
  0x11   :  { %23 = dma.hbm_to_vmem [thread:$0]  %s857_s1, 1024, %s18_s13, [#allocation4], %s739_s22, %s739_s22, %s740_s23  }
  0x12   :  { %s741_s26 = smov [#allocation5]   ;;  %s712_s30 = scalar_lea.hbm %s858_s2, 16 }
  0x13   :  { %s30_s27 = sshll.u32 %s741_s26, 4  ;;  %p713_p8 = scmp.ne.s32.totalorder %s858_s2, %s712_s30  ;;  %s31_s27 = int_to_ptr.vmem [resolvable:$true] %s30_s27 }
  0x14   :  { %p716_p9 = scmp.lt.u32.totalorder %s712_s30, %s858_s2 }
  0x16   :  { %p718_p10 = pnand %p716_p9, %p713_p8 }
  0x18   :  { %721 = shalt.err (!%p718_p10)
}
  0x19   :  { %s722_s8 = scalar_lea.vmem %s31_s27, 16  ;;  %s726_s1 = scalar_lea.vmem %s31_s27, 32 }
  0x1a   :  { %p723_p11 = scmp.ne.s32.totalorder %s31_s27, %s722_s8  ;;  %p727_p12 = scmp.lt.s32.totalorder %s31_s27, %s31_s27 }
  0x1b   :  { %p728_p13 = scmp.lt.s32.totalorder %s726_s1, %s722_s8 }
  0x1d   :  { %p729_p0 = por %p728_p13, %p727_p12 }
  0x1f   :  { %p730_p1 = pnand %p729_p0, %p723_p11 }
  0x21   :  { %733 = shalt.err (!%p730_p1)
}
  0x22   :  { %33 = dma.hbm_to_vmem [thread:$0]  %s858_s2, 16, %s31_s27, [#allocation6]  }
  0x23   :  { %734 = dma.done.wait [#allocation4], 1024  }
  0x24   :  { %735 = vsyncadd [#allocation4], 4294966272 }
  0x25   :  { %736 = dma.done.wait [#allocation6], 16  }
  0x26   :  { %737 = vsyncadd [#allocation6], 4294967280  ;;  %v674_v0 = vld [vmem:[#allocation3] sm:$0xff]   ;;  %v675_v1 = vld [vmem:[#allocation3 + $0x8] sm:$0xff]  }
  0x27   :  { %622 = vmatprep.subr.bf16.mxu0 %v674_v0  ;;  %654 = vmatprep.subr.bf16.mxu1 %v674_v0  ;;  %v676_v2 = vld [vmem:[#allocation3 + $0x10] sm:$0xff]   ;;  %v677_v3 = vld [vmem:[#allocation3 + $0x18] sm:$0xff]   ;;  %v682_v4 = vld [vmem:[%s856_s0] sm:$0xff]  }
  0x28   :  { %623 = vmatpush3.bf16.msra.mxu0 %v674_v0  ;;  %662 = vmatpush3.bf16.msra.mxu1 %v674_v0  ;;  %v683_v5 = vld [vmem:[%s856_s0 + $0x20] sm:$0xff]   ;;  %v679_v7 = vld [vmem:[#allocation3 + $0x28] sm:$0xff]   ;;  %v680_v8 = vld [vmem:[#allocation3 + $0x30] sm:$0xff]  }
  0x29   :  { %624 = vmatprep.subr.bf16.mxu0 %v675_v1  ;;  %655 = vmatprep.subr.bf16.mxu1 %v675_v1  ;;  %v678_v6 = vld [vmem:[#allocation3 + $0x20] sm:$0xff]   ;;  %v681_v9 = vld [vmem:[#allocation3 + $0x38] sm:$0xff]   ;;  %v684_v10 = vld [vmem:[%s856_s0 + $0x8] sm:$0xff]  }
  0x2a   :  { %638 = vmatprep.mubr.bf16.mxu0 %v682_v4  ;;  %646 = vmatprep.mubr.bf16.mxu1 %v683_v5  ;;  %v685_v11 = vld [vmem:[%s856_s0 + $0x28] sm:$0xff]   ;;  %v686_v12 = vld [vmem:[%s856_s0 + $0x10] sm:$0xff]   ;;  %v688_v14 = vld [vmem:[%s856_s0 + $0x18] sm:$0xff]  }
  0x2b   :  { %v687_v13 = vld [vmem:[%s856_s0 + $0x30] sm:$0xff]   ;;  %v689_v15 = vld [vmem:[%s856_s0 + $0x38] sm:$0xff]   ;;  %v810_v16 = vld [vmem:[#allocation5] ss:$0 sm:$0xff] }
  0x2c   :  { %625 = vmatpush3.bf16.msra.mxu0 %v675_v1  ;;  %663 = vmatpush3.bf16.msra.mxu1 %v675_v1 }
  0x2d   :  { %626 = vmatprep.subr.bf16.mxu0 %v676_v2  ;;  %656 = vmatprep.subr.bf16.mxu1 %v676_v2 }
  0x30   :  { %627 = vmatpush3.bf16.msra.mxu0 %v676_v2  ;;  %664 = vmatpush3.bf16.msra.mxu1 %v676_v2 }
  0x31   :  { %628 = vmatprep.subr.bf16.mxu0 %v677_v3  ;;  %657 = vmatprep.subr.bf16.mxu1 %v677_v3 }
  0x34   :  { %629 = vmatpush3.bf16.msra.mxu0 %v677_v3  ;;  %665 = vmatpush3.bf16.msra.mxu1 %v677_v3 }
  0x35   :  { %630 = vmatprep.subr.bf16.mxu0 %v678_v6  ;;  %658 = vmatprep.subr.bf16.mxu1 %v678_v6 }
  0x38   :  { %631 = vmatpush3.bf16.msra.mxu0 %v678_v6  ;;  %666 = vmatpush3.bf16.msra.mxu1 %v678_v6 }
  0x39   :  { %632 = vmatprep.subr.bf16.mxu0 %v679_v7  ;;  %659 = vmatprep.subr.bf16.mxu1 %v679_v7 }
  0x3c   :  { %633 = vmatpush3.bf16.msra.mxu0 %v679_v7  ;;  %667 = vmatpush3.bf16.msra.mxu1 %v679_v7 }
  0x3d   :  { %634 = vmatprep.subr.bf16.mxu0 %v680_v8  ;;  %660 = vmatprep.subr.bf16.mxu1 %v680_v8 }
  0x40   :  { %635 = vmatpush3.bf16.msra.mxu0 %v680_v8  ;;  %668 = vmatpush3.bf16.msra.mxu1 %v680_v8 }
  0x41   :  { %636 = vmatprep.subr.bf16.mxu0 %v681_v9  ;;  %661 = vmatprep.subr.bf16.mxu1 %v681_v9 }
  0x44   :  { %637 = vmatpush3.bf16.msra.mxu0 %v681_v9  ;;  %669 = vmatpush3.bf16.msra.mxu1 %v681_v9 }
  0x47   :  { %639 = vmatmul.mubr.bf16.vlgmr.msra.gmra.mrb[0].mxu0 %v684_v10  ;;  %647 = vmatmul.mubr.bf16.vlgmr.msra.gmra.mrb[0].mxu1 %v685_v11 }
  0x48   :  { %642 = vmatprep.mubr.bf16.mxu0 %v686_v12  ;;  %650 = vmatprep.mubr.bf16.mxu1 %v687_v13 }
  0x4f   :  { %643 = vmatmul.mubr.bf16.gmra.mrb[4].mxu0 %v688_v14  ;;  %651 = vmatmul.mubr.bf16.gmra.mrb[4].mxu1 %v689_v15 }
 0x11a   :  { %v640_v17 = vpop.f32.mrb[0].mxu0  ;;  %v648_v18 = vpop.f32.mrb[0].mxu1 }
 0x11b   :  { %v362_v19 = vadd.f32 %v640_v17, %v810_v16  ;;  %v370_v20 = vadd.f32 %v648_v18, %v810_v16  ;;  %v239_v21 = vpop.f32.mrb[1].mxu0  ;;  %v271_v22 = vpop.f32.mrb[1].mxu1 }
 0x11c   :  { %v360_v23 = vadd.f32 %v810_v16, %v239_v21  ;;  %v368_v24 = vadd.f32 %v810_v16, %v271_v22  ;;  %v641_v25 = vpop.f32.mrb[2].mxu0  ;;  %v649_v26 = vpop.f32.mrb[2].mxu1 }
 0x11d   :  { %vm378_vm0 = vcmp.gt.f32.partialorder %v362_v19, 0.0  ;;  %v394_v27 = vmul.f32 0.2, %v362_v19  ;;  %vm386_vm1 = vcmp.gt.f32.partialorder %v370_v20, 0.0  ;;  %v402_v28 = vmul.f32 0.2, %v370_v20 }
 0x11e   :  { %vm376_vm2 = vcmp.gt.f32.partialorder %v360_v23, 0.0  ;;  %v392_v29 = vmul.f32 0.2, %v360_v23  ;;  %vm384_vm3 = vcmp.gt.f32.partialorder %v368_v24, 0.0  ;;  %v400_v30 = vmul.f32 0.2, %v368_v24 }
 0x11f   :  { %v363_v31 = vadd.f32 %v641_v25, %v810_v16  ;;  %v371_v32 = vadd.f32 %v649_v26, %v810_v16  ;;  %v242_v33 = vpop.f32.mrb[3].mxu0  ;;  %v274_v34 = vpop.f32.mrb[3].mxu1  ;;  %v410_v35 = vsel %vm378_vm0, %v362_v19, %v394_v27  ;;  %v418_v36 = vsel %vm386_vm1, %v370_v20, %v402_v28 }
 0x120   :  { %v361_v37 = vadd.f32 %v810_v16, %v242_v33  ;;  %v369_v38 = vadd.f32 %v810_v16, %v274_v34  ;;  %v408_v43 = vsel %vm376_vm2, %v360_v23, %v392_v29  ;;  %v416_v44 = vsel %vm384_vm3, %v368_v24, %v400_v30 }
 0x121   :  { %vm379_vm4 = vcmp.gt.f32.partialorder %v363_v31, 0.0  ;;  %v395_v39 = vmul.f32 0.2, %v363_v31  ;;  %vm387_vm5 = vcmp.gt.f32.partialorder %v371_v32, 0.0  ;;  %v403_v40 = vmul.f32 0.2, %v371_v32 }
 0x122   :  { %vm377_vm6 = vcmp.gt.f32.partialorder %v361_v37, 0.0  ;;  %v393_v41 = vmul.f32 0.2, %v361_v37  ;;  %vm385_vm7 = vcmp.gt.f32.partialorder %v369_v38, 0.0  ;;  %v401_v42 = vmul.f32 0.2, %v369_v38 }
 0x123   :  { %v411_v45 = vsel %vm379_vm4, %v363_v31, %v395_v39  ;;  %v419_v46 = vsel %vm387_vm5, %v371_v32, %v403_v40  ;;  %v644_v47 = vpop.f32.mrb[4].mxu0  ;;  %v652_v48 = vpop.f32.mrb[4].mxu1 }
 0x124   :  { %v567_v49 = vpack.c.bf16 %v411_v45, %v410_v35  ;;  %v587_v50 = vpack.c.bf16 %v419_v46, %v418_v36  ;;  %v409_v51 = vsel %vm377_vm6, %v361_v37, %v393_v41  ;;  %v417_v52 = vsel %vm385_vm7, %v369_v38, %v401_v42  ;;  %v255_v53 = vpop.f32.mrb[5].mxu0  ;;  %v287_v54 = vpop.f32.mrb[5].mxu1 }
 0x125   :  { %v562_v55 = vpack.c.bf16 %v409_v51, %v408_v43  ;;  %v582_v56 = vpack.c.bf16 %v417_v52, %v416_v44  ;;  %v366_v57 = vadd.f32 %v644_v47, %v810_v16  ;;  %v374_v58 = vadd.f32 %v652_v48, %v810_v16  ;;  %v645_v59 = vpop.f32.mrb[6].mxu0  ;;  %v653_v60 = vpop.f32.mrb[6].mxu1 }
 0x126   :  { %599 = vst [vmem:[%s859_s3 + $0x8] sm:$0xff] %v567_v49   ;;  %603 = vst [vmem:[%s859_s3 + $0x28] sm:$0xff] %v587_v50   ;;  %v364_v61 = vadd.f32 %v810_v16, %v255_v53  ;;  %v372_v62 = vadd.f32 %v810_v16, %v287_v54  ;;  %v367_v63 = vadd.f32 %v645_v59, %v810_v16  ;;  %v258_v1 = vpop.f32.mrb[7].mxu0  ;;  %v290_v2 = vpop.f32.mrb[7].mxu1 }
 0x127   :  { %v375_v0 = vadd.f32 %v653_v60, %v810_v16  ;;  %563 = vst [vmem:[%s859_s3] sm:$0xff] %v562_v55   ;;  %602 = vst [vmem:[%s859_s3 + $0x20] sm:$0xff] %v582_v56   ;;  %v398_v3 = vmul.f32 0.2, %v366_v57  ;;  %vm382_vm8 = vcmp.gt.f32.partialorder %v366_v57, 0.0  ;;  %v406_v4 = vmul.f32 0.2, %v374_v58 }
 0x128   :  { %vm390_vm9 = vcmp.gt.f32.partialorder %v374_v58, 0.0  ;;  %vm380_vm10 = vcmp.gt.f32.partialorder %v364_v61, 0.0  ;;  %vm383_vm11 = vcmp.gt.f32.partialorder %v367_v63, 0.0  ;;  %v399_v5 = vmul.f32 0.2, %v367_v63 }
 0x129   :  { %v396_v6 = vmul.f32 0.2, %v364_v61  ;;  %vm388_vm12 = vcmp.gt.f32.partialorder %v372_v62, 0.0  ;;  %vm391_vm13 = vcmp.gt.f32.partialorder %v375_v0, 0.0  ;;  %v407_v7 = vmul.f32 0.2, %v375_v0 }
 0x12a   :  { %v414_v8 = vsel %vm382_vm8, %v366_v57, %v398_v3  ;;  %v415_v9 = vsel %vm383_vm11, %v367_v63, %v399_v5  ;;  %v365_v10 = vadd.f32 %v810_v16, %v258_v1  ;;  %v373_v11 = vadd.f32 %v810_v16, %v290_v2 }
 0x12b   :  { %v422_v12 = vsel %vm390_vm9, %v374_v58, %v406_v4  ;;  %v404_v13 = vmul.f32 0.2, %v372_v62  ;;  %v577_v14 = vpack.c.bf16 %v415_v9, %v414_v8  ;;  %v423_v15 = vsel %vm391_vm13, %v375_v0, %v407_v7 }
 0x12c   :  { %v597_v17 = vpack.c.bf16 %v423_v15, %v422_v12  ;;  %vm381_vm14 = vcmp.gt.f32.partialorder %v365_v10, 0.0  ;;  %v397_v18 = vmul.f32 0.2, %v365_v10  ;;  %vm389_vm15 = vcmp.gt.f32.partialorder %v373_v11, 0.0 }
 0x12d   :  { %601 = vst [vmem:[%s859_s3 + $0x18] sm:$0xff] %v577_v14   ;;  %v405_v19 = vmul.f32 0.2, %v373_v11  ;;  %v412_v20 = vsel %vm380_vm10, %v364_v61, %v396_v6  ;;  %v420_v21 = vsel %vm388_vm12, %v372_v62, %v404_v13 }
 0x12e   :  { %605 = vst [vmem:[%s859_s3 + $0x38] sm:$0xff] %v597_v17   ;;  %v413_v16 = vsel %vm381_vm14, %v365_v10, %v397_v18 }
 0x12f   :  { %v572_v22 = vpack.c.bf16 %v413_v16, %v412_v20  ;;  %v421_v23 = vsel %vm389_vm15, %v373_v11, %v405_v19 }
 0x130   :  { %v592_v24 = vpack.c.bf16 %v421_v23, %v420_v21 }
 0x131   :  { %600 = vst [vmem:[%s859_s3 + $0x10] sm:$0xff] %v572_v22  }
 0x132   :  { %604 = vst [vmem:[%s859_s3 + $0x30] sm:$0xff] %v592_v24  }
 0x133   :  { %508 = vsyncpa [#allocation4], 1 }
 0x134   :  { %509 = vsyncpa [#allocation6], 1 }

// kernel: discriminator_forward.7
= control target key start
LH: loop header
LB: loop body
LE: loop exit
PB: predicated region body
PF: predicated region fallthrough
CT: control target
= control target key end

     0   :  { %8 = vsyncpa [#allocation4], 0  ;;  %s1428_s0 = inlined_call_operand.vmem [shape: bf16[8,1152], index: 0, kind: input, shape index: {}]   ;;  %s1429_s1 = inlined_call_operand.hbm [shape: bf16[1152,256], index: 1, kind: input, shape index: {}]   ;;  %s1430_s2 = inlined_call_operand.hbm [shape: f32[1,256], index: 2, kind: input, shape index: {}]   ;;  %s1431_s3 = inlined_call_operand.vmem [shape: bf16[8,256], index: 3, kind: output, shape index: {}]  }
   0x1   :  { %10 = vsyncpa [#allocation4 + $0x1], 0 }
   0x2   :  { %11 = vsyncpa [#allocation6], 0  ;;  %s1200_s12 = smov 0   ;;  %s1202_s13 = smov 0  }
   0x3   :  { %s1204_s14 = smov 0   ;;  %s1206_s15 = smov 0  }
   0x4   :  { %s1208_s16 = smov 0   ;;  %s1210_s17 = smov 0  }
   0x5 LB: > { %s842_s18 = sadd.s32 4294967295, %s1172_s17   ;;  %s73_s19 = sadd.s32 1, %s1160_s14  ;;  %s1172_s17 = sphi %s1210_s17, %s17_s17   ;;  %s1168_s16 = sphi %s1208_s16, %s1451_s16   ;;  %s1164_s15 = sphi %s1206_s15, %s1450_s15   ;;  %s1160_s14 = sphi %s1204_s14, %s1449_s14   ;;  %s1156_s13 = sphi %s1202_s13, %s1448_s13   ;;  %s1152_s12 = sphi %s1200_s12, %s1447_s12  }
   0x6   : > { %p80_p0 = scmp.ne.s32.totalorder %s1160_s14, %s1156_s13  ;;  %p81_p1 = scmp.eq.s32.totalorder %s1172_s17, 0 }
   0x7   : > { %p86_p2 = scmp.ne.s32.totalorder %s1156_s13, %s1152_s12  ;;  %p1234_p3 = scmp.eq.s32.totalorder %s842_s18, 0 }
   0x8   : > { %p82_p4 = por %p81_p1, %p80_p0  ;;  %p843_p5 = scmp.ge.s32.totalorder %s1172_s17, 1 }
   0x9   : > { %s1437_s20 = scalar_select %p1234_p3, 1, 0 }
   0xa   : > { %p1241_p6 = por %p1234_p3, %p86_p2  ;;  %p151_p7 = scmp.lt.s32.totalorder %s1172_s17, 4 }
   0xb   : > { %s1174_s23 = smov [#allocation5]   ;;  %p930_p10 = scmp.lt.s32.totalorder %s1172_s17, 3 }
   0xc   : > { %s1438_s21 = scalar_select %p1241_p6, 1, 0 }
   0xd   : > { %p1246_p8 = pnand %p843_p5, %p151_p7  ;;  %s167_s24 = sshll.u32 %s1174_s23, 4  ;;  %s168_s24 = int_to_ptr.vmem [resolvable:$true] %s167_s24 }
   0xe   : > { %s191_s25 = sand.u32 1, %s1160_s14   ;;  %p1260_p12 = pnand %p930_p10, %p82_p4 }
   0xf   : > { %s1439_s22 = scalar_select %p1246_p8, 1, 0 }
  0x10   : > { %p921_p9 = pneg %p1246_p8  ;;  %s1060_s30 = scalar_lea.hbm %s1430_s2, 32 }
  0x11   : > { %s1441_s27 = scalar_select %p1260_p12, 1, 0 }
  0x12   : > { %p1256_p11 = pnand %p921_p9, %p1234_p3  ;;  %p1061_p13 = scmp.ne.s32.totalorder %s1430_s2, %s1060_s30 }
  0x13   : > { %p1067_p5 = scmp.lt.u32.totalorder %s1060_s30, %s1430_s2 }
  0x14   : > { %p1062_p0 = pneg %p1256_p11 }
  0x16   : > { %p1063_p1 = pnand %p1062_p0, %p1061_p13 }
  0x18   : > { %p1064_p2 = pneg %p1063_p1 }
  0x1a   : > { %p1069_p4 = pnand %p1067_p5, %p1064_p2 }
  0x1c   : > { %1072 = shalt.err (!%p1069_p4)
}
  0x1d   : > { %s1073_s8 = scalar_lea.vmem %s168_s24, 32  ;;  %p1081_p3 = scmp.lt.s32.totalorder %s168_s24, %s168_s24 }
  0x1e   : > { %p1074_p7 = scmp.ne.s32.totalorder %s168_s24, %s1073_s8  ;;  %p1082_p6 = scmp.lt.s32.totalorder %s1073_s8, %s1073_s8 }
  0x20   : > { %p1076_p9 = pnand %p1074_p7, %p1062_p0  ;;  %p1083_p8 = por %p1082_p6, %p1081_p3 }
  0x22   : > { %p1077_p10 = pneg %p1076_p9 }
  0x24   : > { %p1084_p12 = pnand %p1083_p8, %p1077_p10 }
  0x26   : > { %1087 = shalt.err (!%p1084_p12)
}
  0x27   : > { %924 = dma.hbm_to_vmem [thread:$0]  (!%p1256_p11), %s1430_s2, 32, %s168_s24, [#allocation6]  }
  0x28   : > { %s29_s11 = sadd.s32 1, %s1168_s16  ;;  %s913_s12 = smul.u32 384, %s191_s25 }
  0x29   : > { %p30_p13 = scmp.ge.s32.totalorder %s29_s11, 3  ;;  %s912_s18 = smul.u32 6144, %s1168_s16 }
  0x2a   : > { %s195_s29 = scalar_lea.vmem [#allocation3], %s913_s12  ;;  %s1301_s5 = scalar_lea.sflag [#allocation4], %s191_s25 }
  0x2b   : > { %s1453_s11 = smov (%p30_p13, %s29_s11), 0  ;;  %s1289_s28 = scalar_lea.hbm %s1429_s1, %s912_s18 }
  0x2c   : > { %s205_s24 = sshll.u32 %s195_s29, 4  ;;  %s68_s30 = ssub.s32 %s1168_s16, %s1453_s11  ;;  %s1293_s24 = int_to_ptr.vmem [resolvable:$true] %s205_s24 }
  0x2d   : > { %p1295_p3 = scmp.eq.s32.totalorder %s68_s30, 0  ;;  %s1088_s6 = scalar_lea.hbm %s1289_s28, 6144 }
  0x2e   : > { %p1089_p6 = scmp.ne.s32.totalorder %s1289_s28, %s1088_s6  ;;  %p1443_p8 = scmp.ne.s32.totalorder %s1441_s27, 0 }
  0x2f   : > { %s1093_s9 = scalar_lea.hbm %s1429_s1, 18432  ;;  %p1094_p1 = scmp.lt.u32.totalorder %s1289_s28, %s1429_s1 }
  0x30   : > { %p1090_p11 = pneg %p1443_p8  ;;  %p1095_p2 = scmp.lt.u32.totalorder %s1093_s9, %s1088_s6 }
  0x31   : > { %p1097_p4 = scmp.lt.u32.totalorder %s1088_s6, %s1289_s28 }
  0x32   : > { %p1091_p12 = pnand %p1090_p11, %p1089_p6  ;;  %p1096_p5 = por %p1095_p2, %p1094_p1 }
  0x34   : > { %p1092_p0 = pneg %p1091_p12  ;;  %p1098_p7 = por %p1097_p4, %p1096_p5 }
  0x36   : > { %p1099_p9 = pnand %p1098_p7, %p1092_p0 }
  0x38   : > { %1102 = shalt.err (!%p1099_p9)
}
  0x39   : > { %s1103_s25 = scalar_lea.vmem %s1293_s24, 6144  ;;  %s1175_s18 = smov [#allocation3]  }
  0x3a   : > { %p1104_p10 = scmp.ne.s32.totalorder %s1293_s24, %s1103_s25  ;;  %s1108_s23 = sshll.u32 %s1175_s18, 4  ;;  %s1109_s23 = int_to_ptr.vmem [resolvable:$false] %s1108_s23 }
  0x3b   : > { %s1110_s26 = scalar_lea.vmem %s1109_s23, 12288  ;;  %p1111_p12 = scmp.lt.s32.totalorder %s1293_s24, %s1109_s23 }
  0x3c   : > { %p1106_p13 = pnand %p1104_p10, %p1090_p11  ;;  %p1112_p1 = scmp.lt.s32.totalorder %s1110_s26, %s1103_s25 }
  0x3e   : > { %p1107_p6 = pneg %p1106_p13  ;;  %p1113_p2 = por %p1112_p1, %p1111_p12 }
  0x40   : > { %p1114_p5 = pnand %p1113_p2, %p1107_p6 }
  0x42   : > { %1117 = shalt.err (!%p1114_p5)
}
  0x43   : > { %s1176_s29 = smov 128   ;;  %s1177_s30 = smov 8  }
  0x44   : > { %928 = dma.hbm_to_vmem [thread:$0]  (!%p1443_p8), %s1289_s28, 6144, %s1293_s24, %s1301_s5, %s1176_s29, %s1176_s29, %s1177_s30  }
  0x45   : > { %s1334_s6 = scalar_select %p1295_p3, %s1160_s14, %s73_s19  }
  0x46   : > { %p1444_p11 = scmp.ne.s32.totalorder %s1439_s22, 0 }
  0x47   : > { %s219_s7 = sand.u32 (!%p1444_p11), 1, %s1156_s13   ;;  %p1445_p0 = scmp.ne.s32.totalorder (!%p1444_p11), %s1438_s21, 0 }
  0x48   : > { %217 = sbr.rel (%p1444_p11) target bundleno = 390 (0x186), region = 32  ;;  %s220_s9 = scalar_lea.sflag (!%p1444_p11), [#allocation4], %s219_s7 }
  0x49   : > { %s914_s8 = smul.u32 (!%p1444_p11), 384, %s219_s7 }
  0x4b   : > { %s1339_s10 = scalar_lea.vmem (!%p1444_p11), [#allocation3], %s914_s8 }
  0x4f   : > { %1143 = dma.done.wait (%p1445_p0), %s220_s9, 6144  }
  0x50   : > { %1145 = vsyncadd (%p1445_p0), %s220_s9, 4294961152  ;;  %p1446_p8 = scmp.ne.s32.totalorder %s1437_s20, 0 }
  0x52   : > { %1147 = dma.done.wait (%p1446_p8), [#allocation6], 32  }
  0x53   : > { %1149 = vsyncadd (%p1446_p8), [#allocation6], 4294967264  ;;  %s263_s19 = smul.u32 3, %s1164_s15  ;;  %p851_p4 = scmp.ne.s32.totalorder %s1164_s15, 0 }
  0x54   : > { %v1178_v0 = vmov (!%p851_p4), 0.0  }
  0x55   : > { %p266_p3 = scmp.lt.s32.totalorder %s263_s19, 8  ;;  %290 = sbr.rel (%p851_p4) target bundleno = 92 (0x5c), region = 44  ;;  %291 = vst [vmem:[#allocation2] sm:$0xff] (!%p851_p4), %v1178_v0  ;;  %292 = vst [vmem:[#allocation2 + $0x8] sm:$0xff] (!%p851_p4), %v1178_v0 }
  0x57   : > { %s1455_s19 = smov (!%p266_p3, %s263_s19), 8 }
  0x58   : > { %s850_s22 = sshll.u32 %s1455_s19, 2 }
  0x59   : > { %s1353_s24 = scalar_lea.vmem %s1428_s0, %s850_s22 }
  0x5c PF: > { %v985_v1 = vld [vmem:[%s1339_s10 + $0x4] ss:$8 sps:$4 sm:$0xff]   ;;  %v987_v2 = vld [vmem:[%s1339_s10] ss:$8 sps:$4 sm:$0xff]   ;;  %v1179_v3 = vmov 0   ;;  %v295_v34 = vld [vmem:[%s1353_s24] sm:$0xff] }
  0x5d   : > { %669 = vmatprep.mubr.bf16.mxu1 %v1179_v3  ;;  %596 = vmatprep.subr.bf16.mxu0 %v985_v1  ;;  %v988_v4 = vld [vmem:[%s1339_s10 + $0x14] ss:$8 sps:$4 sm:$0xff]   ;;  %v990_v5 = vld [vmem:[%s1339_s10 + $0x10] ss:$8 sps:$4 sm:$0xff]   ;;  %v991_v6 = vld [vmem:[%s1339_s10 + $0x24] ss:$8 sps:$4 sm:$0xff]   ;;  %v853_v35 = vcombine.high %v295_v34, %v295_v34  ;;  %v852_v53 = vcombine.low %v295_v34, %v295_v34 }
  0x5e   : > { %597 = vmatpush1.bf16.msra.mxu0 %v987_v2  ;;  %v993_v7 = vld [vmem:[%s1339_s10 + $0x20] ss:$8 sps:$4 sm:$0xff]   ;;  %v994_v8 = vld [vmem:[%s1339_s10 + $0x34] ss:$8 sps:$4 sm:$0xff]   ;;  %v996_v9 = vld [vmem:[%s1339_s10 + $0x30] ss:$8 sps:$4 sm:$0xff]  }
  0x5f   : > { %598 = vmatprep.subr.bf16.mxu0 %v988_v4  ;;  %v1009_v10 = vld [vmem:[%s1339_s10 + $0x104] ss:$8 sps:$4 sm:$0xff]   ;;  %v1011_v11 = vld [vmem:[%s1339_s10 + $0x100] ss:$8 sps:$4 sm:$0xff]   ;;  %v1015_v13 = vld [vmem:[%s1339_s10 + $0x114] ss:$8 sps:$4 sm:$0xff]   ;;  %628 = vmatprep.mubr.bf16.mxu0 %v853_v35 }
  0x60   : > { %v997_v12 = vld [vmem:[%s1339_s10 + $0x44] ss:$8 sps:$4 sm:$0xff]   ;;  %637 = vmatprep.subr.bf16.mxu1 %v1009_v10  ;;  %v1017_v14 = vld [vmem:[%s1339_s10 + $0x110] ss:$8 sps:$4 sm:$0xff]   ;;  %v999_v15 = vld [vmem:[%s1339_s10 + $0x40] ss:$8 sps:$4 sm:$0xff]  }
  0x61   : > { %638 = vmatpush1.bf16.msra.mxu1 %v1011_v11  ;;  %v1000_v16 = vld [vmem:[%s1339_s10 + $0x54] ss:$8 sps:$4 sm:$0xff]   ;;  %v1021_v17 = vld [vmem:[%s1339_s10 + $0x124] ss:$8 sps:$4 sm:$0xff]   ;;  %v1023_v18 = vld [vmem:[%s1339_s10 + $0x120] ss:$8 sps:$4 sm:$0xff]  }
  0x62   : > { %599 = vmatpush1.bf16.msra.mxu0 %v990_v5  ;;  %639 = vmatprep.subr.bf16.mxu1 %v1015_v13  ;;  %v1002_v19 = vld [vmem:[%s1339_s10 + $0x50] ss:$8 sps:$4 sm:$0xff]   ;;  %v1027_v20 = vld [vmem:[%s1339_s10 + $0x134] ss:$8 sps:$4 sm:$0xff]   ;;  %v1003_v21 = vld [vmem:[%s1339_s10 + $0x64] ss:$8 sps:$4 sm:$0xff]  }
  0x63   : > { %600 = vmatprep.subr.bf16.mxu0 %v991_v6  ;;  %v1029_v22 = vld [vmem:[%s1339_s10 + $0x130] ss:$8 sps:$4 sm:$0xff]   ;;  %v1005_v23 = vld [vmem:[%s1339_s10 + $0x60] ss:$8 sps:$4 sm:$0xff]   ;;  %v1033_v24 = vld [vmem:[%s1339_s10 + $0x144] ss:$8 sps:$4 sm:$0xff]  }
  0x64   : > { %v1006_v25 = vld [vmem:[%s1339_s10 + $0x74] ss:$8 sps:$4 sm:$0xff]   ;;  %v1035_v26 = vld [vmem:[%s1339_s10 + $0x140] ss:$8 sps:$4 sm:$0xff]   ;;  %v1008_v27 = vld [vmem:[%s1339_s10 + $0x70] ss:$8 sps:$4 sm:$0xff]  }
  0x65   : > { %640 = vmatpush1.bf16.msra.mxu1 %v1017_v14  ;;  %v1039_v28 = vld [vmem:[%s1339_s10 + $0x154] ss:$8 sps:$4 sm:$0xff]   ;;  %v1012_v29 = vld [vmem:[%s1339_s10 + $0x84] ss:$8 sps:$4 sm:$0xff]   ;;  %v1041_v30 = vld [vmem:[%s1339_s10 + $0x150] ss:$8 sps:$4 sm:$0xff]  }
  0x66   : > { %601 = vmatpush1.bf16.msra.mxu0 %v993_v7  ;;  %641 = vmatprep.subr.bf16.mxu1 %v1021_v17  ;;  %v1014_v31 = vld [vmem:[%s1339_s10 + $0x80] ss:$8 sps:$4 sm:$0xff]   ;;  %v1045_v32 = vld [vmem:[%s1339_s10 + $0x164] ss:$8 sps:$4 sm:$0xff]   ;;  %v1018_v33 = vld [vmem:[%s1339_s10 + $0x94] ss:$8 sps:$4 sm:$0xff]  }
  0x67   : > { %602 = vmatprep.subr.bf16.mxu0 %v994_v8  ;;  %v1047_v36 = vld [vmem:[%s1339_s10 + $0x160] ss:$8 sps:$4 sm:$0xff]   ;;  %v1020_v37 = vld [vmem:[%s1339_s10 + $0x90] ss:$8 sps:$4 sm:$0xff]   ;;  %v1051_v38 = vld [vmem:[%s1339_s10 + $0x174] ss:$8 sps:$4 sm:$0xff]  }
  0x68   : > { %v1024_v39 = vld [vmem:[%s1339_s10 + $0xa4] ss:$8 sps:$4 sm:$0xff]   ;;  %v1053_v40 = vld [vmem:[%s1339_s10 + $0x170] ss:$8 sps:$4 sm:$0xff]   ;;  %v1026_v41 = vld [vmem:[%s1339_s10 + $0xa0] ss:$8 sps:$4 sm:$0xff]  }
  0x69   : > { %642 = vmatpush1.bf16.msra.mxu1 %v1023_v18  ;;  %v1030_v42 = vld [vmem:[%s1339_s10 + $0xb4] ss:$8 sps:$4 sm:$0xff]   ;;  %v1057_v43 = vld [vmem:[%s1353_s24 + $0x8] ss:$0 sps:$4 sm:$0xff]   ;;  %v1036_v45 = vld [vmem:[%s1339_s10 + $0xc4] ss:$8 sps:$4 sm:$0xff]  }
  0x6a   : > { %603 = vmatpush1.bf16.msra.mxu0 %v996_v9  ;;  %643 = vmatprep.subr.bf16.mxu1 %v1027_v20  ;;  %v1032_v44 = vld [vmem:[%s1339_s10 + $0xb0] ss:$8 sps:$4 sm:$0xff]   ;;  %v1038_v46 = vld [vmem:[%s1339_s10 + $0xc0] ss:$8 sps:$4 sm:$0xff]   ;;  %v1042_v47 = vld [vmem:[%s1339_s10 + $0xd4] ss:$8 sps:$4 sm:$0xff]  }
  0x6b   : > { %604 = vmatprep.subr.bf16.mxu0 %v997_v12  ;;  %v1044_v48 = vld [vmem:[%s1339_s10 + $0xd0] ss:$8 sps:$4 sm:$0xff]   ;;  %v1048_v49 = vld [vmem:[%s1339_s10 + $0xe4] ss:$8 sps:$4 sm:$0xff]   ;;  %v1050_v50 = vld [vmem:[%s1339_s10 + $0xe0] ss:$8 sps:$4 sm:$0xff]  }
  0x6c   : > { %v1054_v51 = vld [vmem:[%s1339_s10 + $0xf4] ss:$8 sps:$4 sm:$0xff]   ;;  %v1056_v52 = vld [vmem:[%s1339_s10 + $0xf0] ss:$8 sps:$4 sm:$0xff]   ;;  %p903_p7 = scmp.ne.s32.totalorder %s1164_s15, 2 }
  0x6d   : > { %644 = vmatpush1.bf16.msra.mxu1 %v1029_v22  ;;  %v293_v58 = vld [vmem:[#allocation2] sm:$0xff]  ;;  %v294_v61 = vld [vmem:[#allocation2 + $0x8] sm:$0xff]  ;;  %v690_v4 = vlaneseq (!%p903_p7)  ;;  %v688_v6 = vld [vmem:[#allocation5] sm:$0x3] (!%p903_p7) }
  0x6e   : > { %605 = vmatpush1.bf16.msra.mxu0 %v999_v15  ;;  %645 = vmatprep.subr.bf16.mxu1 %v1033_v24 }
  0x6f   : > { %606 = vmatprep.subr.bf16.mxu0 %v1000_v16  ;;  %v691_v5 = vshrl.u32 (!%p903_p7), %v690_v4, 7 }
  0x71   : > { %646 = vmatpush1.bf16.msra.mxu1 %v1035_v26  ;;  %v692_v7 = vsub.s32 (!%p903_p7), 0, %v691_v5  ;;  %v696_v8 = vsub.s32 (!%p903_p7), 1, %v691_v5 }
  0x72   : > { %607 = vmatpush1.bf16.msra.mxu0 %v1002_v19  ;;  %647 = vmatprep.subr.bf16.mxu1 %v1039_v28 }
  0x73   : > { %608 = vmatprep.subr.bf16.mxu0 %v1003_v21  ;;  %v693_v11 = vrot.slane (!%p903_p7), %v688_v6, %v692_v7  ;;  %v697_v12 = vrot.slane (!%p903_p7), %v688_v6, %v696_v8 }
  0x75   : > { %648 = vmatpush1.bf16.msra.mxu1 %v1041_v30 }
  0x76   : > { %609 = vmatpush1.bf16.msra.mxu0 %v1005_v23  ;;  %649 = vmatprep.subr.bf16.mxu1 %v1045_v32 }
  0x77   : > { %610 = vmatprep.subr.bf16.mxu0 %v1006_v25 }
  0x79   : > { %650 = vmatpush1.bf16.msra.mxu1 %v1047_v36 }
  0x7a   : > { %611 = vmatpush1.bf16.msra.mxu0 %v1008_v27  ;;  %651 = vmatprep.subr.bf16.mxu1 %v1051_v38 }
  0x7b   : > { %612 = vmatprep.subr.bf16.mxu0 %v1012_v29 }
  0x7d   : > { %652 = vmatpush1.bf16.msra.mxu1 %v1053_v40 }
  0x7e   : > { %613 = vmatpush1.bf16.msra.mxu0 %v1014_v31 }
  0x7f   : > { %614 = vmatprep.subr.bf16.mxu0 %v1018_v33 }
  0x80   : > { %670 = vmatmul.mubr.bf16.vlgmr.msra.gmra.mrb[0].mxu1 %v1057_v43 }
  0x82   : > { %615 = vmatpush1.bf16.msra.mxu0 %v1020_v37 }
  0x83   : > { %616 = vmatprep.subr.bf16.mxu0 %v1024_v39 }
  0x86   : > { %617 = vmatpush1.bf16.msra.mxu0 %v1026_v41 }
  0x87   : > { %618 = vmatprep.subr.bf16.mxu0 %v1030_v42 }
  0x8a   : > { %619 = vmatpush1.bf16.msra.mxu0 %v1032_v44 }
  0x8b   : > { %620 = vmatprep.subr.bf16.mxu0 %v1036_v45 }
  0x8e   : > { %621 = vmatpush1.bf16.msra.mxu0 %v1038_v46 }
  0x8f   : > { %622 = vmatprep.subr.bf16.mxu0 %v1042_v47 }
  0x92   : > { %623 = vmatpush1.bf16.msra.mxu0 %v1044_v48 }
  0x93   : > { %624 = vmatprep.subr.bf16.mxu0 %v1048_v49 }
  0x96   : > { %625 = vmatpush1.bf16.msra.mxu0 %v1050_v50 }
  0x97   : > { %626 = vmatprep.subr.bf16.mxu0 %v1054_v51 }
  0x9a   : > { %627 = vmatpush1.bf16.msra.mxu0 %v1056_v52 }
  0x9d   : > { %629 = vmatmul.mubr.bf16.vlgmr.msra.gmra.mrb[0].mxu0 %v852_v53 }
 0x153   : > { %v671_v54 = vpop.f32.mrb[0].mxu1 }
 0x154   : > { %v673_v55 = vpop.f32.mrb[1].mxu1 }
 0x155   : > { %v675_v56 = vpop.f32.mrb[2].mxu1 }
 0x156   : > { %v676_v57 = vpop.f32.mrb[3].mxu1 }
 0x170   : > { %v630_v59 = vpop.f32.mrb[0].mxu0  ;;  %685 = sbr.rel (%p903_p7) target bundleno = 390 (0x186), region = 48 }
 0x171   : > { %v672_v60 = vadd.f32 %v671_v54, %v630_v59  ;;  %v632_v62 = vpop.f32.mrb[1].mxu0 }
 0x172   : > { %v674_v63 = vadd.f32 %v673_v55, %v632_v62  ;;  %v634_v0 = vpop.f32.mrb[2].mxu0 }
 0x173   : > { %v678_v1 = vadd.f32 %v672_v60, %v293_v58  ;;  %v635_v2 = vpop.f32.mrb[3].mxu0 }
 0x174   : > { %v679_v3 = vadd.f32 %v674_v63, %v294_v61 }
 0x175   : > { %680 = vst [vmem:[#allocation2] sm:$0xff] %v678_v1 }
 0x176   : > { %681 = vst [vmem:[#allocation2 + $0x8] sm:$0xff] %v679_v3 }
 0x17c   : > { %v686_v9 = vld [vmem:[#allocation2] sm:$0xff] }
 0x17d   : > { %v687_v10 = vld [vmem:[#allocation2 + $0x8] sm:$0xff]  ;;  %v700_v13 = vadd.f32 %v693_v11, %v686_v9 }
 0x17e   : > { %v701_v14 = vadd.f32 %v697_v12, %v687_v10 }
 0x17f   : > { %vm702_vm0 = vcmp.gt.f32.partialorder %v700_v13, 0.0  ;;  %v704_v15 = vmul.f32 0.2, %v700_v13 }
 0x180   : > { %vm703_vm1 = vcmp.gt.f32.partialorder %v701_v14, 0.0  ;;  %v705_v16 = vmul.f32 0.2, %v701_v14 }
 0x181   : > { %v706_v17 = vsel %vm702_vm0, %v700_v13, %v704_v15 }
 0x182   : > { %v707_v18 = vsel %vm703_vm1, %v701_v14, %v705_v16 }
 0x183   : > { %v911_v19 = vpack.c.bf16 %v707_v18, %v706_v17 }
 0x185   : > { %716 = vst [vmem:[%s1431_s3] sm:$0xff] %v911_v19 }
 0x186 PF: > { %s17_s17 = sadd.s32 1, %s1172_s17   ;;  %s1447_s12 = smov %s1156_s13 }
 0x187   : > { %p14_p9 = scmp.ge.s32.totalorder %s17_s17, 5   ;;  %s1448_s13 = smov %s1160_s14 }
 0x188   : > { %s1449_s14 = smov %s1334_s6  ;;  %s1450_s15 = smov %s1168_s16 }
 0x189   : > { %s1451_s16 = smov %s1453_s11  ;;  %16 = sbr.rel (!%p14_p9) target bundleno = 5 (0x5), region = 88 }
 0x190   :  { %747 = vsyncpa [#allocation4], 1 }
 0x191   :  { %749 = vsyncpa [#allocation4 + $0x1], 1 }
 0x192   :  { %750 = vsyncpa [#allocation6], 1 }

// kernel: discriminator_forward.8
= control target key start
LH: loop header
LB: loop body
LE: loop exit
PB: predicated region body
PF: predicated region fallthrough
CT: control target
= control target key end

     0   :  { %s1323_s12 = smov 0   ;;  %s1325_s13 = smov 0   ;;  %s1586_s0 = inlined_call_operand.vmem [shape: bf16[8,2304], index: 0, kind: input, shape index: {}]   ;;  %s1587_s1 = inlined_call_operand.vmem [shape: bf16[2304,512], index: 1, kind: input, shape index: {}]   ;;  %s1588_s2 = inlined_call_operand.vmem [shape: f32[1,512], index: 2, kind: input, shape index: {}]   ;;  %s1589_s3 = inlined_call_operand.vmem [shape: bf16[8,512], index: 3, kind: output, shape index: {}]  }
   0x1   :  { %s1327_s14 = smov 0   ;;  %s1329_s15 = smov 0  }
   0x2   :  { %s1331_s16 = smov 0   ;;  %s1333_s17 = smov 0  }
   0x3   :  { %s1335_s18 = smov 0  }
   0x4 LB: > { %s25_s19 = sadd.s32 1, %s1291_s16  ;;  %s28_s20 = sadd.s32 1, %s1295_s17  ;;  %s1299_s18 = sphi %s1335_s18, %s13_s18   ;;  %s1295_s17 = sphi %s1333_s17, %s1595_s17   ;;  %s1291_s16 = sphi %s1331_s16, %s1594_s16   ;;  %s1287_s15 = sphi %s1329_s15, %s1593_s15   ;;  %s1283_s14 = sphi %s1327_s14, %s1592_s14   ;;  %s1279_s13 = sphi %s1325_s13, %s1591_s13   ;;  %s1275_s12 = sphi %s1323_s12, %s1590_s12  }
   0x5   : > { %p26_p0 = scmp.ge.s32.totalorder %s25_s19, 6  ;;  %p76_p1 = scmp.ne.s32.totalorder %s1279_s13, %s1275_s12 }
   0x6   : > { %p77_p2 = scmp.eq.s32.totalorder %s1299_s18, 0  ;;  %s69_s24 = sadd.s32 1, %s1279_s13 }
   0x7   : > { %s1597_s19 = smov (%p26_p0, %s25_s19), 0  ;;  %s1599_s20 = smov (!%p26_p0, %s28_s20), %s1295_s17 }
   0x8   : > { %p78_p3 = por %p77_p2, %p76_p1  ;;  %p30_p4 = scmp.ge.s32.totalorder %s1599_s20, 2 }
   0x9   : > { %s64_s21 = ssub.s32 %s1291_s16, %s1597_s19  ;;  %p1043_p6 = scmp.ge.s32.totalorder %s1299_s18, 12 }
   0xa   : > { %s1601_s20 = smov (%p30_p4, %s1599_s20), 0 }
   0xb   : > { %s65_s22 = ssub.s32 %s1295_s17, %s1601_s20  ;;  %156 = sbr.rel (%p1043_p6) target bundleno = 50 (0x32), region = 16 }
   0xc   : > { %s66_s23 = sor.u32 %s65_s22, %s64_s21 }
   0xd   : > { %p67_p5 = scmp.eq.s32.totalorder %s66_s23, 0 }
   0xf   : > { %s1374_s25 = scalar_select %p67_p5, %s1279_s13, %s69_s24  }
  0x12   : > { %172 = sbr.rel (!%p78_p3) target bundleno = 50 (0x32), region = 24  ;;  %s174_s26 = sand.u32 (%p78_p3), 1, %s1279_s13  }
  0x13   : > { %s1110_s27 = smul.u32 (%p78_p3), 384, %s174_s26  ;;  %s1044_s28 = sshll.u32 (%p78_p3), %s1295_s17, 1 }
  0x14   : > { %s1108_s29 = smul.u32 (%p78_p3), 192, %s1291_s16 }
  0x15   : > { %s1388_s8 = scalar_lea.vmem (%p78_p3), [#allocation3], %s1110_s27 }
  0x16   : > { %s180_s30 = sadd.s32 (%p78_p3), %s1108_s29, %s1044_s28 }
  0x17   : > { %s1046_s4 = sshll.u32 (%p78_p3), %s180_s30, 2 }
  0x18   : > { %s1383_s7 = scalar_lea.vmem (%p78_p3), %s1587_s1, %s1046_s4 }
  0x19   : > { %v304_v0 = vld [vmem:[%s1383_s7] sm:$0xff]  ;;  %v306_v1 = vld [vmem:[%s1383_s7 + $0x10] sm:$0xff] }
  0x1a   : > { %v308_v2 = vld [vmem:[%s1383_s7 + $0x20] sm:$0xff]  ;;  %305 = vst [vmem:[%s1388_s8] sm:$0xff] %v304_v0  ;;  %307 = vst [vmem:[%s1388_s8 + $0x8] sm:$0xff] %v306_v1  ;;  %v310_v3 = vld [vmem:[%s1383_s7 + $0x30] sm:$0xff] }
  0x1b   : > { %309 = vst [vmem:[%s1388_s8 + $0x10] sm:$0xff] %v308_v2  ;;  %v312_v4 = vld [vmem:[%s1383_s7 + $0x40] sm:$0xff]  ;;  %v314_v5 = vld [vmem:[%s1383_s7 + $0x50] sm:$0xff]  ;;  %311 = vst [vmem:[%s1388_s8 + $0x18] sm:$0xff] %v310_v3 }
  0x1c   : > { %313 = vst [vmem:[%s1388_s8 + $0x20] sm:$0xff] %v312_v4  ;;  %315 = vst [vmem:[%s1388_s8 + $0x28] sm:$0xff] %v314_v5  ;;  %v316_v6 = vld [vmem:[%s1383_s7 + $0x60] sm:$0xff]  ;;  %v318_v7 = vld [vmem:[%s1383_s7 + $0x70] sm:$0xff] }
  0x1d   : > { %v320_v8 = vld [vmem:[%s1383_s7 + $0x80] sm:$0xff]  ;;  %317 = vst [vmem:[%s1388_s8 + $0x30] sm:$0xff] %v316_v6  ;;  %319 = vst [vmem:[%s1388_s8 + $0x38] sm:$0xff] %v318_v7  ;;  %v322_v9 = vld [vmem:[%s1383_s7 + $0x90] sm:$0xff] }
  0x1e   : > { %321 = vst [vmem:[%s1388_s8 + $0x40] sm:$0xff] %v320_v8  ;;  %v324_v10 = vld [vmem:[%s1383_s7 + $0xa0] sm:$0xff]  ;;  %v326_v11 = vld [vmem:[%s1383_s7 + $0xb0] sm:$0xff]  ;;  %323 = vst [vmem:[%s1388_s8 + $0x48] sm:$0xff] %v322_v9 }
  0x1f   : > { %325 = vst [vmem:[%s1388_s8 + $0x50] sm:$0xff] %v324_v10  ;;  %327 = vst [vmem:[%s1388_s8 + $0x58] sm:$0xff] %v326_v11  ;;  %v328_v12 = vld [vmem:[%s1383_s7 + $0xc0] sm:$0xff]  ;;  %v330_v13 = vld [vmem:[%s1383_s7 + $0xd0] sm:$0xff] }
  0x20   : > { %v332_v14 = vld [vmem:[%s1383_s7 + $0xe0] sm:$0xff]  ;;  %329 = vst [vmem:[%s1388_s8 + $0x60] sm:$0xff] %v328_v12  ;;  %331 = vst [vmem:[%s1388_s8 + $0x68] sm:$0xff] %v330_v13  ;;  %v334_v15 = vld [vmem:[%s1383_s7 + $0xf0] sm:$0xff] }
  0x21   : > { %333 = vst [vmem:[%s1388_s8 + $0x70] sm:$0xff] %v332_v14  ;;  %v336_v16 = vld [vmem:[%s1383_s7 + $0x100] sm:$0xff]  ;;  %v338_v17 = vld [vmem:[%s1383_s7 + $0x110] sm:$0xff]  ;;  %335 = vst [vmem:[%s1388_s8 + $0x78] sm:$0xff] %v334_v15 }
  0x22   : > { %337 = vst [vmem:[%s1388_s8 + $0x80] sm:$0xff] %v336_v16  ;;  %339 = vst [vmem:[%s1388_s8 + $0x88] sm:$0xff] %v338_v17  ;;  %v340_v18 = vld [vmem:[%s1383_s7 + $0x120] sm:$0xff]  ;;  %v342_v19 = vld [vmem:[%s1383_s7 + $0x130] sm:$0xff] }
  0x23   : > { %v344_v20 = vld [vmem:[%s1383_s7 + $0x140] sm:$0xff]  ;;  %341 = vst [vmem:[%s1388_s8 + $0x90] sm:$0xff] %v340_v18  ;;  %343 = vst [vmem:[%s1388_s8 + $0x98] sm:$0xff] %v342_v19  ;;  %v346_v21 = vld [vmem:[%s1383_s7 + $0x150] sm:$0xff] }
  0x24   : > { %345 = vst [vmem:[%s1388_s8 + $0xa0] sm:$0xff] %v344_v20  ;;  %v348_v22 = vld [vmem:[%s1383_s7 + $0x160] sm:$0xff]  ;;  %v350_v23 = vld [vmem:[%s1383_s7 + $0x170] sm:$0xff]  ;;  %347 = vst [vmem:[%s1388_s8 + $0xa8] sm:$0xff] %v346_v21 }
  0x25   : > { %349 = vst [vmem:[%s1388_s8 + $0xb0] sm:$0xff] %v348_v22  ;;  %351 = vst [vmem:[%s1388_s8 + $0xb8] sm:$0xff] %v350_v23  ;;  %v352_v24 = vld [vmem:[%s1383_s7 + $0x180] sm:$0xff]  ;;  %v354_v25 = vld [vmem:[%s1383_s7 + $0x190] sm:$0xff] }
  0x26   : > { %v356_v26 = vld [vmem:[%s1383_s7 + $0x1a0] sm:$0xff]  ;;  %353 = vst [vmem:[%s1388_s8 + $0xc0] sm:$0xff] %v352_v24  ;;  %355 = vst [vmem:[%s1388_s8 + $0xc8] sm:$0xff] %v354_v25  ;;  %v358_v27 = vld [vmem:[%s1383_s7 + $0x1b0] sm:$0xff] }
  0x27   : > { %357 = vst [vmem:[%s1388_s8 + $0xd0] sm:$0xff] %v356_v26  ;;  %v360_v28 = vld [vmem:[%s1383_s7 + $0x1c0] sm:$0xff]  ;;  %v362_v29 = vld [vmem:[%s1383_s7 + $0x1d0] sm:$0xff]  ;;  %359 = vst [vmem:[%s1388_s8 + $0xd8] sm:$0xff] %v358_v27 }
  0x28   : > { %361 = vst [vmem:[%s1388_s8 + $0xe0] sm:$0xff] %v360_v28  ;;  %363 = vst [vmem:[%s1388_s8 + $0xe8] sm:$0xff] %v362_v29  ;;  %v364_v30 = vld [vmem:[%s1383_s7 + $0x1e0] sm:$0xff]  ;;  %v366_v31 = vld [vmem:[%s1383_s7 + $0x1f0] sm:$0xff] }
  0x29   : > { %v368_v32 = vld [vmem:[%s1383_s7 + $0x200] sm:$0xff]  ;;  %365 = vst [vmem:[%s1388_s8 + $0xf0] sm:$0xff] %v364_v30  ;;  %367 = vst [vmem:[%s1388_s8 + $0xf8] sm:$0xff] %v366_v31  ;;  %v370_v33 = vld [vmem:[%s1383_s7 + $0x210] sm:$0xff] }
  0x2a   : > { %369 = vst [vmem:[%s1388_s8 + $0x100] sm:$0xff] %v368_v32  ;;  %v372_v34 = vld [vmem:[%s1383_s7 + $0x220] sm:$0xff]  ;;  %v374_v35 = vld [vmem:[%s1383_s7 + $0x230] sm:$0xff]  ;;  %371 = vst [vmem:[%s1388_s8 + $0x108] sm:$0xff] %v370_v33 }
  0x2b   : > { %373 = vst [vmem:[%s1388_s8 + $0x110] sm:$0xff] %v372_v34  ;;  %375 = vst [vmem:[%s1388_s8 + $0x118] sm:$0xff] %v374_v35  ;;  %v376_v36 = vld [vmem:[%s1383_s7 + $0x240] sm:$0xff]  ;;  %v378_v37 = vld [vmem:[%s1383_s7 + $0x250] sm:$0xff] }
  0x2c   : > { %v380_v38 = vld [vmem:[%s1383_s7 + $0x260] sm:$0xff]  ;;  %377 = vst [vmem:[%s1388_s8 + $0x120] sm:$0xff] %v376_v36  ;;  %379 = vst [vmem:[%s1388_s8 + $0x128] sm:$0xff] %v378_v37  ;;  %v382_v39 = vld [vmem:[%s1383_s7 + $0x270] sm:$0xff] }
  0x2d   : > { %381 = vst [vmem:[%s1388_s8 + $0x130] sm:$0xff] %v380_v38  ;;  %v384_v40 = vld [vmem:[%s1383_s7 + $0x280] sm:$0xff]  ;;  %v386_v41 = vld [vmem:[%s1383_s7 + $0x290] sm:$0xff]  ;;  %383 = vst [vmem:[%s1388_s8 + $0x138] sm:$0xff] %v382_v39 }
  0x2e   : > { %385 = vst [vmem:[%s1388_s8 + $0x140] sm:$0xff] %v384_v40  ;;  %387 = vst [vmem:[%s1388_s8 + $0x148] sm:$0xff] %v386_v41  ;;  %v388_v42 = vld [vmem:[%s1383_s7 + $0x2a0] sm:$0xff]  ;;  %v390_v43 = vld [vmem:[%s1383_s7 + $0x2b0] sm:$0xff] }
  0x2f   : > { %v392_v44 = vld [vmem:[%s1383_s7 + $0x2c0] sm:$0xff]  ;;  %389 = vst [vmem:[%s1388_s8 + $0x150] sm:$0xff] %v388_v42  ;;  %391 = vst [vmem:[%s1388_s8 + $0x158] sm:$0xff] %v390_v43  ;;  %v394_v45 = vld [vmem:[%s1383_s7 + $0x2d0] sm:$0xff] }
  0x30   : > { %393 = vst [vmem:[%s1388_s8 + $0x160] sm:$0xff] %v392_v44  ;;  %v396_v46 = vld [vmem:[%s1383_s7 + $0x2e0] sm:$0xff]  ;;  %v398_v47 = vld [vmem:[%s1383_s7 + $0x2f0] sm:$0xff]  ;;  %395 = vst [vmem:[%s1388_s8 + $0x168] sm:$0xff] %v394_v45 }
  0x31   : > { %397 = vst [vmem:[%s1388_s8 + $0x170] sm:$0xff] %v396_v46  ;;  %399 = vst [vmem:[%s1388_s8 + $0x178] sm:$0xff] %v398_v47 }
  0x32 PF: > { %p1047_p7 = scmp.ge.s32.totalorder %s1299_s18, 1  ;;  %p412_p8 = scmp.lt.s32.totalorder %s1299_s18, 13 }
  0x34   : > { %p413_p9 = pnand %p1047_p7, %p412_p8 }
  0x35   : > { %s419_s9 = sand.u32 (!%p413_p9), 1, %s1275_s12   ;;  %s459_s10 = smul.u32 (!%p413_p9), 3, %s1283_s14 }
  0x36   : > { %416 = sbr.rel (%p413_p9) target bundleno = 369 (0x171), region = 66  ;;  %s1049_s21 = sshll.u32 (!%p413_p9), %s1287_s15, 1 }
  0x37   : > { %s1111_s11 = smul.u32 (!%p413_p9), 384, %s419_s9  ;;  %p462_p10 = scmp.lt.s32.totalorder (!%p413_p9), %s459_s10, 17 }
  0x38   : > { %p472_p11 = scmp.lt.s32.totalorder (!%p413_p9), %s1049_s21, 3  ;;  %p1052_p12 = scmp.ne.s32.totalorder (!%p413_p9), %s1283_s14, 0 }
  0x39   : > { %s1505_s5 = scalar_lea.vmem (!%p413_p9), [#allocation3], %s1111_s11 }
  0x3d   : > { %s1603_s10 = smov (!%p462_p10, %s459_s10), 17  ;;  %s1605_s21 = smov (!%p472_p11, %s1049_s21), 3 }
  0x3e   : > { %s1048_s22 = sshll.u32 %s1603_s10, 2  ;;  %s474_s12 = scalar_lea.vmem %s1588_s2, %s1605_s21  ;;  %v1301_v48 = vmov (!%p1052_p12), 0.0  }
  0x3f   : > { %s1493_s26 = scalar_lea.vmem %s1586_s0, %s1048_s22  ;;  %s1051_s29 = sshll.u32 %s1605_s21, 2  ;;  %491 = vst [vmem:[#allocation2] sm:$0xff] (!%p1052_p12), %v1301_v48  ;;  %492 = vst [vmem:[#allocation2 + $0x8] sm:$0xff] (!%p1052_p12), %v1301_v48 }
  0x40   : > { %s1503_s4 = scalar_lea.vmem %s1589_s3, %s1051_s29  ;;  %490 = sbr.rel (%p1052_p12) target bundleno = 71 (0x47), region = 74 }
  0x47 PF: > { %v1170_v49 = vld [vmem:[%s1505_s5 + $0x4] ss:$8 sps:$4 sm:$0xff]   ;;  %v1172_v50 = vld [vmem:[%s1505_s5] ss:$8 sps:$4 sm:$0xff]   ;;  %v1302_v51 = vmov 0   ;;  %v495_v18 = vld [vmem:[%s1493_s26] sm:$0xff] }
  0x48   : > { %869 = vmatprep.mubr.bf16.mxu1 %v1302_v51  ;;  %796 = vmatprep.subr.bf16.mxu0 %v1170_v49  ;;  %v1173_v52 = vld [vmem:[%s1505_s5 + $0x14] ss:$8 sps:$4 sm:$0xff]   ;;  %v1175_v53 = vld [vmem:[%s1505_s5 + $0x10] ss:$8 sps:$4 sm:$0xff]   ;;  %v1176_v54 = vld [vmem:[%s1505_s5 + $0x24] ss:$8 sps:$4 sm:$0xff]   ;;  %v1054_v19 = vcombine.high %v495_v18, %v495_v18  ;;  %v1053_v37 = vcombine.low %v495_v18, %v495_v18 }
  0x49   : > { %797 = vmatpush1.bf16.msra.mxu0 %v1172_v50  ;;  %v1178_v55 = vld [vmem:[%s1505_s5 + $0x20] ss:$8 sps:$4 sm:$0xff]   ;;  %v1179_v56 = vld [vmem:[%s1505_s5 + $0x34] ss:$8 sps:$4 sm:$0xff]   ;;  %v1181_v57 = vld [vmem:[%s1505_s5 + $0x30] ss:$8 sps:$4 sm:$0xff]  }
  0x4a   : > { %798 = vmatprep.subr.bf16.mxu0 %v1173_v52  ;;  %v1194_v58 = vld [vmem:[%s1505_s5 + $0x104] ss:$8 sps:$4 sm:$0xff]   ;;  %v1196_v59 = vld [vmem:[%s1505_s5 + $0x100] ss:$8 sps:$4 sm:$0xff]   ;;  %v1200_v61 = vld [vmem:[%s1505_s5 + $0x114] ss:$8 sps:$4 sm:$0xff]   ;;  %828 = vmatprep.mubr.bf16.mxu0 %v1054_v19 }
  0x4b   : > { %v1182_v60 = vld [vmem:[%s1505_s5 + $0x44] ss:$8 sps:$4 sm:$0xff]   ;;  %837 = vmatprep.subr.bf16.mxu1 %v1194_v58  ;;  %v1202_v62 = vld [vmem:[%s1505_s5 + $0x110] ss:$8 sps:$4 sm:$0xff]   ;;  %v1184_v63 = vld [vmem:[%s1505_s5 + $0x40] ss:$8 sps:$4 sm:$0xff]  }
  0x4c   : > { %838 = vmatpush1.bf16.msra.mxu1 %v1196_v59  ;;  %v1185_v0 = vld [vmem:[%s1505_s5 + $0x54] ss:$8 sps:$4 sm:$0xff]   ;;  %v1206_v1 = vld [vmem:[%s1505_s5 + $0x124] ss:$8 sps:$4 sm:$0xff]   ;;  %v1208_v2 = vld [vmem:[%s1505_s5 + $0x120] ss:$8 sps:$4 sm:$0xff]  }
  0x4d   : > { %799 = vmatpush1.bf16.msra.mxu0 %v1175_v53  ;;  %839 = vmatprep.subr.bf16.mxu1 %v1200_v61  ;;  %v1187_v3 = vld [vmem:[%s1505_s5 + $0x50] ss:$8 sps:$4 sm:$0xff]   ;;  %v1212_v4 = vld [vmem:[%s1505_s5 + $0x134] ss:$8 sps:$4 sm:$0xff]   ;;  %v1188_v5 = vld [vmem:[%s1505_s5 + $0x64] ss:$8 sps:$4 sm:$0xff]  }
  0x4e   : > { %800 = vmatprep.subr.bf16.mxu0 %v1176_v54  ;;  %v1214_v6 = vld [vmem:[%s1505_s5 + $0x130] ss:$8 sps:$4 sm:$0xff]   ;;  %v1190_v7 = vld [vmem:[%s1505_s5 + $0x60] ss:$8 sps:$4 sm:$0xff]   ;;  %v1218_v8 = vld [vmem:[%s1505_s5 + $0x144] ss:$8 sps:$4 sm:$0xff]  }
  0x4f   : > { %v1191_v9 = vld [vmem:[%s1505_s5 + $0x74] ss:$8 sps:$4 sm:$0xff]   ;;  %v1220_v10 = vld [vmem:[%s1505_s5 + $0x140] ss:$8 sps:$4 sm:$0xff]   ;;  %v1193_v11 = vld [vmem:[%s1505_s5 + $0x70] ss:$8 sps:$4 sm:$0xff]  }
  0x50   : > { %840 = vmatpush1.bf16.msra.mxu1 %v1202_v62  ;;  %v1224_v12 = vld [vmem:[%s1505_s5 + $0x154] ss:$8 sps:$4 sm:$0xff]   ;;  %v1197_v13 = vld [vmem:[%s1505_s5 + $0x84] ss:$8 sps:$4 sm:$0xff]   ;;  %v1226_v14 = vld [vmem:[%s1505_s5 + $0x150] ss:$8 sps:$4 sm:$0xff]  }
  0x51   : > { %801 = vmatpush1.bf16.msra.mxu0 %v1178_v55  ;;  %841 = vmatprep.subr.bf16.mxu1 %v1206_v1  ;;  %v1199_v15 = vld [vmem:[%s1505_s5 + $0x80] ss:$8 sps:$4 sm:$0xff]   ;;  %v1230_v16 = vld [vmem:[%s1505_s5 + $0x164] ss:$8 sps:$4 sm:$0xff]   ;;  %v1203_v17 = vld [vmem:[%s1505_s5 + $0x94] ss:$8 sps:$4 sm:$0xff]  }
  0x52   : > { %802 = vmatprep.subr.bf16.mxu0 %v1179_v56  ;;  %v1232_v20 = vld [vmem:[%s1505_s5 + $0x160] ss:$8 sps:$4 sm:$0xff]   ;;  %v1205_v21 = vld [vmem:[%s1505_s5 + $0x90] ss:$8 sps:$4 sm:$0xff]   ;;  %v1236_v22 = vld [vmem:[%s1505_s5 + $0x174] ss:$8 sps:$4 sm:$0xff]  }
  0x53   : > { %v1209_v23 = vld [vmem:[%s1505_s5 + $0xa4] ss:$8 sps:$4 sm:$0xff]   ;;  %v1238_v24 = vld [vmem:[%s1505_s5 + $0x170] ss:$8 sps:$4 sm:$0xff]   ;;  %v1211_v25 = vld [vmem:[%s1505_s5 + $0xa0] ss:$8 sps:$4 sm:$0xff]  }
  0x54   : > { %842 = vmatpush1.bf16.msra.mxu1 %v1208_v2  ;;  %v1215_v26 = vld [vmem:[%s1505_s5 + $0xb4] ss:$8 sps:$4 sm:$0xff]   ;;  %v1242_v27 = vld [vmem:[%s1493_s26 + $0x8] ss:$0 sps:$4 sm:$0xff]   ;;  %v1221_v29 = vld [vmem:[%s1505_s5 + $0xc4] ss:$8 sps:$4 sm:$0xff]  }
  0x55   : > { %803 = vmatpush1.bf16.msra.mxu0 %v1181_v57  ;;  %843 = vmatprep.subr.bf16.mxu1 %v1212_v4  ;;  %v1217_v28 = vld [vmem:[%s1505_s5 + $0xb0] ss:$8 sps:$4 sm:$0xff]   ;;  %v1223_v30 = vld [vmem:[%s1505_s5 + $0xc0] ss:$8 sps:$4 sm:$0xff]   ;;  %v1227_v31 = vld [vmem:[%s1505_s5 + $0xd4] ss:$8 sps:$4 sm:$0xff]  }
  0x56   : > { %804 = vmatprep.subr.bf16.mxu0 %v1182_v60  ;;  %v1229_v32 = vld [vmem:[%s1505_s5 + $0xd0] ss:$8 sps:$4 sm:$0xff]   ;;  %v1233_v33 = vld [vmem:[%s1505_s5 + $0xe4] ss:$8 sps:$4 sm:$0xff]   ;;  %v1235_v34 = vld [vmem:[%s1505_s5 + $0xe0] ss:$8 sps:$4 sm:$0xff]  }
  0x57   : > { %v1239_v35 = vld [vmem:[%s1505_s5 + $0xf4] ss:$8 sps:$4 sm:$0xff]   ;;  %v1241_v36 = vld [vmem:[%s1505_s5 + $0xf0] ss:$8 sps:$4 sm:$0xff]   ;;  %p1104_p13 = scmp.ne.s32.totalorder %s1283_s14, 5 }
  0x58   : > { %844 = vmatpush1.bf16.msra.mxu1 %v1214_v6  ;;  %v493_v42 = vld [vmem:[#allocation2] sm:$0xff]  ;;  %v494_v45 = vld [vmem:[#allocation2 + $0x8] sm:$0xff]  ;;  %v890_v52 = vlaneseq (!%p1104_p13) }
  0x59   : > { %805 = vmatpush1.bf16.msra.mxu0 %v1184_v63  ;;  %845 = vmatprep.subr.bf16.mxu1 %v1218_v8  ;;  %v888_v54 = vld [vmem:[%s474_s12] sm:$0x3] (!%p1104_p13) }
  0x5a   : > { %806 = vmatprep.subr.bf16.mxu0 %v1185_v0  ;;  %v891_v53 = vshrl.u32 (!%p1104_p13), %v890_v52, 7 }
  0x5c   : > { %846 = vmatpush1.bf16.msra.mxu1 %v1220_v10  ;;  %v892_v55 = vsub.s32 (!%p1104_p13), 0, %v891_v53  ;;  %v896_v56 = vsub.s32 (!%p1104_p13), 1, %v891_v53 }
  0x5d   : > { %807 = vmatpush1.bf16.msra.mxu0 %v1187_v3  ;;  %847 = vmatprep.subr.bf16.mxu1 %v1224_v12 }
  0x5e   : > { %808 = vmatprep.subr.bf16.mxu0 %v1188_v5  ;;  %v893_v59 = vrot.slane (!%p1104_p13), %v888_v54, %v892_v55  ;;  %v897_v60 = vrot.slane (!%p1104_p13), %v888_v54, %v896_v56 }
  0x60   : > { %848 = vmatpush1.bf16.msra.mxu1 %v1226_v14 }
  0x61   : > { %809 = vmatpush1.bf16.msra.mxu0 %v1190_v7  ;;  %849 = vmatprep.subr.bf16.mxu1 %v1230_v16 }
  0x62   : > { %810 = vmatprep.subr.bf16.mxu0 %v1191_v9 }
  0x64   : > { %850 = vmatpush1.bf16.msra.mxu1 %v1232_v20 }
  0x65   : > { %811 = vmatpush1.bf16.msra.mxu0 %v1193_v11  ;;  %851 = vmatprep.subr.bf16.mxu1 %v1236_v22 }
  0x66   : > { %812 = vmatprep.subr.bf16.mxu0 %v1197_v13 }
  0x68   : > { %852 = vmatpush1.bf16.msra.mxu1 %v1238_v24 }
  0x69   : > { %813 = vmatpush1.bf16.msra.mxu0 %v1199_v15 }
  0x6a   : > { %814 = vmatprep.subr.bf16.mxu0 %v1203_v17 }
  0x6b   : > { %870 = vmatmul.mubr.bf16.vlgmr.msra.gmra.mrb[0].mxu1 %v1242_v27 }
  0x6d   : > { %815 = vmatpush1.bf16.msra.mxu0 %v1205_v21 }
  0x6e   : > { %816 = vmatprep.subr.bf16.mxu0 %v1209_v23 }
  0x71   : > { %817 = vmatpush1.bf16.msra.mxu0 %v1211_v25 }
  0x72   : > { %818 = vmatprep.subr.bf16.mxu0 %v1215_v26 }
  0x75   : > { %819 = vmatpush1.bf16.msra.mxu0 %v1217_v28 }
  0x76   : > { %820 = vmatprep.subr.bf16.mxu0 %v1221_v29 }
  0x79   : > { %821 = vmatpush1.bf16.msra.mxu0 %v1223_v30 }
  0x7a   : > { %822 = vmatprep.subr.bf16.mxu0 %v1227_v31 }
  0x7d   : > { %823 = vmatpush1.bf16.msra.mxu0 %v1229_v32 }
  0x7e   : > { %824 = vmatprep.subr.bf16.mxu0 %v1233_v33 }
  0x81   : > { %825 = vmatpush1.bf16.msra.mxu0 %v1235_v34 }
  0x82   : > { %826 = vmatprep.subr.bf16.mxu0 %v1239_v35 }
  0x85   : > { %827 = vmatpush1.bf16.msra.mxu0 %v1241_v36 }
  0x88   : > { %829 = vmatmul.mubr.bf16.vlgmr.msra.gmra.mrb[0].mxu0 %v1053_v37 }
 0x13e   : > { %v871_v38 = vpop.f32.mrb[0].mxu1 }
 0x13f   : > { %v873_v39 = vpop.f32.mrb[1].mxu1 }
 0x140   : > { %v875_v40 = vpop.f32.mrb[2].mxu1 }
 0x141   : > { %v876_v41 = vpop.f32.mrb[3].mxu1 }
 0x15b   : > { %v830_v43 = vpop.f32.mrb[0].mxu0  ;;  %885 = sbr.rel (%p1104_p13) target bundleno = 369 (0x171), region = 78 }
 0x15c   : > { %v872_v44 = vadd.f32 %v871_v38, %v830_v43  ;;  %v832_v46 = vpop.f32.mrb[1].mxu0 }
 0x15d   : > { %v874_v47 = vadd.f32 %v873_v39, %v832_v46  ;;  %v834_v48 = vpop.f32.mrb[2].mxu0 }
 0x15e   : > { %v878_v49 = vadd.f32 %v872_v44, %v493_v42  ;;  %v835_v50 = vpop.f32.mrb[3].mxu0 }
 0x15f   : > { %v879_v51 = vadd.f32 %v874_v47, %v494_v45 }
 0x160   : > { %880 = vst [vmem:[#allocation2] sm:$0xff] %v878_v49 }
 0x161   : > { %881 = vst [vmem:[#allocation2 + $0x8] sm:$0xff] %v879_v51 }
 0x167   : > { %v886_v57 = vld [vmem:[#allocation2] sm:$0xff] }
 0x168   : > { %v887_v58 = vld [vmem:[#allocation2 + $0x8] sm:$0xff]  ;;  %v900_v61 = vadd.f32 %v893_v59, %v886_v57 }
 0x169   : > { %v901_v62 = vadd.f32 %v897_v60, %v887_v58 }
 0x16a   : > { %vm902_vm0 = vcmp.gt.f32.partialorder %v900_v61, 0.0  ;;  %v904_v63 = vmul.f32 0.2, %v900_v61 }
 0x16b   : > { %vm903_vm1 = vcmp.gt.f32.partialorder %v901_v62, 0.0  ;;  %v905_v0 = vmul.f32 0.2, %v901_v62 }
 0x16c   : > { %v906_v1 = vsel %vm902_vm0, %v900_v61, %v904_v63 }
 0x16d   : > { %v907_v2 = vsel %vm903_vm1, %v901_v62, %v905_v0 }
 0x16e   : > { %v1109_v3 = vpack.c.bf16 %v907_v2, %v906_v1 }
 0x170   : > { %916 = vst [vmem:[%s1503_s4] sm:$0xff] %v1109_v3 }
 0x171 PF: > { %s13_s18 = sadd.s32 1, %s1299_s18   ;;  %s1590_s12 = smov %s1279_s13 }
 0x172   : > { %p10_p0 = scmp.ge.s32.totalorder %s13_s18, 14   ;;  %s1591_s13 = smov %s1374_s25 }
 0x173   : > { %s1592_s14 = smov %s1291_s16  ;;  %s1593_s15 = smov %s1295_s17 }
 0x174   : > { %s1594_s16 = smov %s1597_s19  ;;  %s1595_s17 = smov %s1601_s20 }
 0x175   :  { %12 = sbr.rel (!%p10_p0) target bundleno = 4 (0x4), region = 119 }

// kernel: discriminator_forward.9
= control target key start
LH: loop header
LB: loop body
LE: loop exit
PB: predicated region body
PF: predicated region fallthrough
CT: control target
= control target key end

     0   :  { %s940_s12 = smov 0   ;;  %s942_s13 = smov 0   ;;  %s1023_s0 = inlined_call_operand.vmem [shape: bf16[8,4608], index: 0, kind: input, shape index: {}]   ;;  %s1024_s1 = inlined_call_operand.vmem [shape: bf16[4608,128], index: 1, kind: input, shape index: {}]   ;;  %s1025_s2 = inlined_call_operand.vmem [shape: f32[1,128], index: 2, kind: input, shape index: {}]   ;;  %s1026_s3 = inlined_call_operand.vmem [shape: f32[8,128], index: 3, kind: output, shape index: {}]  }
   0x1   :  { %s944_s14 = smov 0  }
   0x2 LB: > { %s25_s15 = sadd.s32 1, %s913_s13  ;;  %p743_p0 = scmp.ge.s32.totalorder %s917_s14, 1  ;;  %s917_s14 = sphi %s944_s14, %s13_s14   ;;  %s913_s13 = sphi %s942_s13, %s1028_s13   ;;  %s909_s12 = sphi %s940_s12, %s1027_s12  }
   0x3   : > { %p26_p1 = scmp.ge.s32.totalorder %s25_s15, 9  ;;  %p189_p2 = scmp.lt.s32.totalorder %s917_s14, 10 }
   0x5   : > { %s1030_s15 = smov (%p26_p1, %s25_s15), 0  ;;  %p190_p3 = pnand %p743_p0, %p189_p2 }
   0x6   : > { %s744_s16 = sshll.u32 (!%p190_p3), %s909_s12, 2  ;;  %s746_s17 = sshll.u32 (!%p190_p3), %s909_s12, 6 }
   0x7   : > { %193 = sbr.rel (%p190_p3) target bundleno = 289 (0x121), region = 32  ;;  %p233_p4 = scmp.lt.s32.totalorder (!%p190_p3), %s744_s16, 35 }
   0x8   : > { %p241_p5 = scmp.lt.s32.totalorder (!%p190_p3), %s746_s17, 575  ;;  %p748_p6 = scmp.ne.s32.totalorder (!%p190_p3), %s909_s12, 0 }
   0xe   : > { %s1032_s16 = smov (!%p233_p4, %s744_s16), 35  ;;  %s1034_s17 = smov (!%p241_p5, %s746_s17), 575 }
   0xf   : > { %s745_s18 = sshll.u32 %s1032_s16, 2  ;;  %s747_s22 = sshll.u32 %s1034_s17, 2  ;;  %v919_v0 = vmov (!%p748_p6), 0.0  }
  0x10   : > { %s965_s21 = scalar_lea.vmem %s1023_s0, %s745_s18  ;;  %s970_s25 = scalar_lea.vmem %s1024_s1, %s747_s22  ;;  %264 = vst [vmem:[#allocation2] sm:$0xff] (!%p748_p6), %v919_v0 }
  0x11   : > { %263 = sbr.rel (%p748_p6) target bundleno = 24 (0x18), region = 36 }
  0x18 PF: > { %v859_v1 = vld [vmem:[%s970_s25 + $0x40] sm:$0xff]   ;;  %v863_v5 = vld [vmem:[%s970_s25 + $0x48] sm:$0xff]   ;;  %v867_v9 = vld [vmem:[%s970_s25 + $0x50] sm:$0xff]   ;;  %p785_p7 = scmp.ne.s32.totalorder %s909_s12, 8 }
  0x19   : > { %v860_v2 = vld [vmem:[%s970_s25 + $0xc0] sm:$0xff]   ;;  %790 = vmatprep.subr.bf16.mxu0 %v859_v1  ;;  %v864_v6 = vld [vmem:[%s970_s25 + $0xc8] sm:$0xff]   ;;  %v868_v10 = vld [vmem:[%s970_s25 + $0xd0] sm:$0xff]  }
  0x1a   : > { %v861_v3 = vld [vmem:[%s970_s25] sm:$0xff]   ;;  %812 = vmatprep.subr.bf16.mxu1 %v860_v2  ;;  %v865_v7 = vld [vmem:[%s970_s25 + $0x8] sm:$0xff]   ;;  %v869_v11 = vld [vmem:[%s970_s25 + $0x10] sm:$0xff]  }
  0x1b   : > { %v862_v4 = vld [vmem:[%s970_s25 + $0x80] sm:$0xff]   ;;  %791 = vmatpush3.bf16.msra.mxu0 %v861_v3  ;;  %v866_v8 = vld [vmem:[%s970_s25 + $0x88] sm:$0xff]   ;;  %v870_v12 = vld [vmem:[%s970_s25 + $0x90] sm:$0xff]  }
  0x1c   : > { %813 = vmatpush3.bf16.msra.mxu1 %v862_v4  ;;  %792 = vmatprep.subr.bf16.mxu0 %v863_v5  ;;  %v871_v13 = vld [vmem:[%s970_s25 + $0x58] sm:$0xff]   ;;  %v875_v17 = vld [vmem:[%s970_s25 + $0x60] sm:$0xff]   ;;  %v879_v21 = vld [vmem:[%s970_s25 + $0x68] sm:$0xff]  }
  0x1d   : > { %814 = vmatprep.subr.bf16.mxu1 %v864_v6  ;;  %v872_v14 = vld [vmem:[%s970_s25 + $0xd8] sm:$0xff]   ;;  %v876_v18 = vld [vmem:[%s970_s25 + $0xe0] sm:$0xff]   ;;  %v880_v22 = vld [vmem:[%s970_s25 + $0xe8] sm:$0xff]  }
  0x1e   : > { %v873_v15 = vld [vmem:[%s970_s25 + $0x18] sm:$0xff]   ;;  %v877_v19 = vld [vmem:[%s970_s25 + $0x20] sm:$0xff]   ;;  %v881_v23 = vld [vmem:[%s970_s25 + $0x28] sm:$0xff]  }
  0x1f   : > { %793 = vmatpush3.bf16.msra.mxu0 %v865_v7  ;;  %v874_v16 = vld [vmem:[%s970_s25 + $0x98] sm:$0xff]   ;;  %v878_v20 = vld [vmem:[%s970_s25 + $0xa0] sm:$0xff]   ;;  %v882_v24 = vld [vmem:[%s970_s25 + $0xa8] sm:$0xff]  }
  0x20   : > { %815 = vmatpush3.bf16.msra.mxu1 %v866_v8  ;;  %794 = vmatprep.subr.bf16.mxu0 %v867_v9  ;;  %v883_v25 = vld [vmem:[%s970_s25 + $0x70] sm:$0xff]   ;;  %v887_v29 = vld [vmem:[%s970_s25 + $0x78] sm:$0xff]   ;;  %v266_v33 = vld [vmem:[%s965_s21] sm:$0xff] }
  0x21   : > { %816 = vmatprep.subr.bf16.mxu1 %v868_v10  ;;  %v884_v26 = vld [vmem:[%s970_s25 + $0xf0] sm:$0xff]   ;;  %v888_v30 = vld [vmem:[%s970_s25 + $0xf8] sm:$0xff]   ;;  %v267_v34 = vld [vmem:[%s965_s21 + $0x8] sm:$0xff]  ;;  %v749_v35 = vcombine.low %v266_v33, %v266_v33  ;;  %v750_v36 = vcombine.high %v266_v33, %v266_v33 }
  0x22   : > { %v885_v27 = vld [vmem:[%s970_s25 + $0x30] sm:$0xff]   ;;  %v889_v31 = vld [vmem:[%s970_s25 + $0x38] sm:$0xff]   ;;  %v751_v37 = vcombine.low %v267_v34, %v267_v34  ;;  %v752_v38 = vcombine.high %v267_v34, %v267_v34  ;;  %v265_v47 = vld [vmem:[#allocation2] sm:$0xff] }
  0x23   : > { %795 = vmatpush3.bf16.msra.mxu0 %v869_v11  ;;  %v886_v28 = vld [vmem:[%s970_s25 + $0xb0] sm:$0xff]   ;;  %v890_v32 = vld [vmem:[%s970_s25 + $0xb8] sm:$0xff]   ;;  %570 = vmatprep.mubr.bf16.mxu0 %v750_v36  ;;  %v786_v53 = vld [vmem:[%s1025_s2] ss:$0 sm:$0xff] (!%p785_p7) }
  0x24   : > { %817 = vmatpush3.bf16.msra.mxu1 %v870_v12  ;;  %796 = vmatprep.subr.bf16.mxu0 %v871_v13 }
  0x25   : > { %818 = vmatprep.subr.bf16.mxu1 %v872_v14  ;;  %610 = vmatprep.mubr.bf16.mxu1 %v752_v38 }
  0x27   : > { %797 = vmatpush3.bf16.msra.mxu0 %v873_v15 }
  0x28   : > { %819 = vmatpush3.bf16.msra.mxu1 %v874_v16  ;;  %798 = vmatprep.subr.bf16.mxu0 %v875_v17 }
  0x29   : > { %820 = vmatprep.subr.bf16.mxu1 %v876_v18 }
  0x2b   : > { %799 = vmatpush3.bf16.msra.mxu0 %v877_v19 }
  0x2c   : > { %821 = vmatpush3.bf16.msra.mxu1 %v878_v20  ;;  %800 = vmatprep.subr.bf16.mxu0 %v879_v21 }
  0x2d   : > { %822 = vmatprep.subr.bf16.mxu1 %v880_v22 }
  0x2f   : > { %801 = vmatpush3.bf16.msra.mxu0 %v881_v23 }
  0x30   : > { %823 = vmatpush3.bf16.msra.mxu1 %v882_v24  ;;  %802 = vmatprep.subr.bf16.mxu0 %v883_v25 }
  0x31   : > { %824 = vmatprep.subr.bf16.mxu1 %v884_v26 }
  0x33   : > { %803 = vmatpush3.bf16.msra.mxu0 %v885_v27 }
  0x34   : > { %825 = vmatpush3.bf16.msra.mxu1 %v886_v28  ;;  %804 = vmatprep.subr.bf16.mxu0 %v887_v29 }
  0x35   : > { %826 = vmatprep.subr.bf16.mxu1 %v888_v30 }
  0x37   : > { %805 = vmatpush3.bf16.msra.mxu0 %v889_v31 }
  0x38   : > { %827 = vmatpush3.bf16.msra.mxu1 %v890_v32 }
  0x3a   : > { %571 = vmatmul.mubr.bf16.vlgmr.msra.gmra.mrb[0].mxu0 %v749_v35 }
  0x3b   : > { %611 = vmatmul.mubr.bf16.vlgmr.msra.gmra.mrb[0].mxu1 %v751_v37 }
 0x10d   : > { %v806_v39 = vpop.f32.mrb[0].mxu0 }
 0x10e   : > { %v828_v40 = vpop.f32.mrb[0].mxu1  ;;  %v807_v41 = vpop.f32.mrb[1].mxu0 }
 0x10f   : > { %v829_v42 = vpop.f32.mrb[1].mxu1  ;;  %v808_v43 = vadd.f32 %v807_v41, %v806_v39  ;;  %v809_v45 = vpop.f32.mrb[2].mxu0 }
 0x110   : > { %v830_v44 = vadd.f32 %v829_v42, %v828_v40  ;;  %v831_v46 = vpop.f32.mrb[2].mxu1  ;;  %v810_v48 = vpop.f32.mrb[3].mxu0  ;;  %623 = sbr.rel (%p785_p7) target bundleno = 289 (0x121), region = 40 }
 0x111   : > { %v832_v49 = vpop.f32.mrb[3].mxu1 }
 0x112   : > { %v613_v50 = vadd.f32 %v830_v44, %v808_v43 }
 0x114   : > { %v618_v51 = vadd.f32 %v613_v50, %v265_v47 }
 0x116   : > { %619 = vst [vmem:[#allocation2] sm:$0xff] %v618_v51 }
 0x11d   : > { %v624_v52 = vld [vmem:[#allocation2] sm:$0xff] }
 0x11e   : > { %v632_v54 = vadd.f32 %v786_v53, %v624_v52 }
 0x120   : > { %633 = vst [vmem:[%s1026_s3] sm:$0xff] %v632_v54 }
 0x121 PF: > { %s13_s14 = sadd.s32 1, %s917_s14   ;;  %s1027_s12 = smov %s913_s13 }
 0x122   : > { %p10_p8 = scmp.ge.s32.totalorder %s13_s14, 11   ;;  %s1028_s13 = smov %s1030_s15 }
 0x124   :  { %12 = sbr.rel (!%p10_p8) target bundleno = 2 (0x2), region = 76 }

</bundles_post_ra>
